<compile_context>
chip_gen: v7x
topology: tpu7x:2x2x1
jax: 0.10.0
libtpu: 0.0.40
codegen_flags: <defaults>
</compile_context>

<pallas_src>
import functools

import jax
import jax.numpy as jnp
import numpy as np
from jax.experimental import pallas as pl
from jax.experimental.pallas import tpu as pltpu

IN_DIM = 26       # n1 input features
ACT_DIM = 19      # n3 output features
LANE_PAD = 128    # lane-dense softmax/output width
NEG_BIG = -1e30   # bias for padded lanes -> exp underflows to exactly 0


# ----------------------------------------------------------------------------
# Kernel: one batch tile of the fused MLP + row softmax.
# Refs: s [TB,26] f32, w1 [26,1024] f32, b1 [1,1024] f32,
#       w2 [1024,512] bf16, b2 [1,512] f32,
#       w3p [512,128] bf16, b3p [1,128] f32  ->  out [TB,128] f32
# Weights are stored [in, out], so y = x @ W + b (== PyTorch x @ W.T + b).
# ----------------------------------------------------------------------------
def actor_kernel(s_ref, w1_ref, b1_ref, w2_ref, b2_ref, w3_ref, b3_ref, out_ref):
    x = s_ref[...]

    # n1 + tanh (tiny contraction dim -> keep f32 operands)
    z1 = jnp.dot(x, w1_ref[...], preferred_element_type=jnp.float32) + b1_ref[...]
    h1 = jnp.tanh(z1)                              # tanh in f32 (v5e-safe)
    h1b = h1.astype(jnp.bfloat16)                  # bf16 operand for the big matmul

    # n2 + tanh: bf16 x bf16 -> f32 accumulation on the MXU
    z2 = jnp.dot(h1b, w2_ref[...], preferred_element_type=jnp.float32) + b2_ref[...]
    h2 = jnp.tanh(z2)
    h2b = h2.astype(jnp.bfloat16)

    # n3 + row softmax over a 128-lane slab (padded lanes carry -1e30 bias)
    logits = (
        jnp.dot(h2b, w3_ref[...], preferred_element_type=jnp.float32) + b3_ref[...]
    )
    m = jnp.max(logits, axis=-1, keepdims=True)
    e = jnp.exp(logits - m)
    denom = jnp.sum(e, axis=-1, keepdims=True)
    out_ref[...] = e / denom                       # exact divide: rows sum to 1


# ----------------------------------------------------------------------------
# One-time parameter preparation (hoisted out of the forward path):
# lane-pad the last layer and cast the heavy weights to bf16.
# ----------------------------------------------------------------------------
def prepare_params(params):
    w1, b1, w2, b2, w3, b3 = params
    K3 = w3.shape[0]
    w3p = jnp.zeros((K3, LANE_PAD), jnp.float32).at[:, :ACT_DIM].set(w3)
    b3p = jnp.full((1, LANE_PAD), NEG_BIG, jnp.float32).at[:, :ACT_DIM].set(b3)
    return (
        w1.astype(jnp.float32),
        b1.astype(jnp.float32),
        w2.astype(jnp.bfloat16),     # dominant matmul in bf16
        b2.astype(jnp.float32),
        w3p.astype(jnp.bfloat16),    # padded zero columns stay exactly zero
        b3p.astype(jnp.float32),
    )


# ----------------------------------------------------------------------------
# Wrapper: pads batch to a multiple of the batch tile, launches a 1-D batch
# grid with resident weights, slices the result back to [B, 19].
# ----------------------------------------------------------------------------
@functools.partial(jax.jit, static_argnames=("tb",))
def actor_forward(s, prepared, tb=512):
    w1, b1, w2, b2, w3p, b3p = prepared
    B, F = s.shape

    # Batch tile: multiple of 8 (sublane), capped at `tb` rows per grid step,
    # and capped at ceil(B/2) so the grid has >=2 steps (v7x megacore sharding).
    half = -(-B // 2)
    TB = min(tb, max(8, ((half + 7) // 8) * 8))
    B_pad = ((B + TB - 1) // TB) * TB
    if B_pad != B:
        s = jnp.pad(s, ((0, B_pad - B), (0, 0)))

    # Constant index_map -> weights DMA'd once and stay resident in VMEM.
    resident = lambda arr: pl.BlockSpec(arr.shape, lambda i: (0, 0))  # noqa: E731

    out = pl.pallas_call(
        actor_kernel,
        out_shape=jax.ShapeDtypeStruct((B_pad, LANE_PAD), jnp.float32),
        grid=(B_pad // TB,),
        in_specs=[
            pl.BlockSpec((TB, F), lambda i: (i, 0)),   # s tile, pipelined
            resident(w1), resident(b1),
            resident(w2), resident(b2),
            resident(w3p), resident(b3p),
        ],
        out_specs=pl.BlockSpec((TB, LANE_PAD), lambda i: (i, 0)),
        compiler_params=pltpu.CompilerParams(
            dimension_semantics=("parallel",),   # megacore-shard batch on v7x
            vmem_limit_bytes=32 << 20,           # ~1.3 MiB bf16 weights + tiles + acts
        ),
    )(s, w1, b1, w2, b2, w3p, b3p)

    return out[:B, :ACT_DIM]


# ----------------------------------------------------------------------------
# Deterministic parameter init (mirrors orthogonal_init: orthogonal W, zero b).
# Weights stored as [in, out] (transpose of PyTorch's [out, in]).
# ----------------------------------------------------------------------------
def make_params(key):
    k1, k2, k3 = jax.random.split(key, 3)
    ortho = jax.nn.initializers.orthogonal(scale=1.0)
    w1 = ortho(k1, (IN_DIM, 1024), jnp.float32)   # n1
    w2 = ortho(k2, (1024, 512), jnp.float32)      # n2
    w3 = ortho(k3, (512, ACT_DIM), jnp.float32)   # n3
    b1 = jnp.zeros((1, 1024), jnp.float32)
    b2 = jnp.zeros((1, 512), jnp.float32)
    b3 = jnp.zeros((1, ACT_DIM), jnp.float32)
    return (w1, b1, w2, b2, w3, b3)


def reference_forward(s, params):
    w1, b1, w2, b2, w3, b3 = params
    h = jnp.tanh(s @ w1 + b1)
    h = jnp.tanh(h @ w2 + b2)
    return jax.nn.softmax(h @ w3 + b3, axis=1)


if __name__ == "__main__":
    key = jax.random.PRNGKey(0)
    pkey, skey1, skey2 = jax.random.split(key, 3)
    params = make_params(pkey)
    prepared = prepare_params(params)     # one-time pad + bf16 cast

    # Tolerances: bf16 operands on layers 2/3 (f32 accumulation) vs f32 reference.
    ATOL, RTOL = 2e-3, 2e-2

    # Small batch (single grid step, TB=8).
    s_small = jax.random.normal(skey1, (8, IN_DIM), dtype=jnp.float32)
    out_small = jax.block_until_ready(actor_forward(s_small, prepared))
    ref_small = reference_forward(s_small, params)
    np.testing.assert_allclose(
        np.asarray(out_small), np.asarray(ref_small), atol=ATOL, rtol=RTOL
    )
    np.testing.assert_allclose(
        np.asarray(out_small).sum(axis=1), np.ones(8), atol=1e-4
    )

    # Batch that is not a multiple of the tile -> exercises batch grid + padding
    # (TB = 24, grid = (2,) so both v7x TensorCores would get work).
    B = 40
    s_big = jax.random.normal(skey2, (B, IN_DIM), dtype=jnp.float32)
    out_big = jax.block_until_ready(actor_forward(s_big, prepared))
    ref_big = reference_forward(s_big, params)
    np.testing.assert_allclose(
        np.asarray(out_big), np.asarray(ref_big), atol=ATOL, rtol=RTOL
    )
    np.testing.assert_allclose(
        np.asarray(out_big).sum(axis=1), np.ones(B), atol=1e-4
    )

    print("KERNEL_OK")
</pallas_src>

<mosaic_0001>
module attributes {stable_mosaic.version = 11 : i64} {
  func.func @actor_kernel(%arg0: i32, %arg1: memref<8x26xf32, #tpu.memory_space<vmem>>, %arg2: memref<26x1024xf32, #tpu.memory_space<vmem>>, %arg3: memref<1x1024xf32, #tpu.memory_space<vmem>>, %arg4: memref<1024x512xbf16, #tpu.memory_space<vmem>>, %arg5: memref<1x512xf32, #tpu.memory_space<vmem>>, %arg6: memref<512x128xbf16, #tpu.memory_space<vmem>>, %arg7: memref<1x128xf32, #tpu.memory_space<vmem>>, %arg8: memref<8x128xf32, #tpu.memory_space<vmem>>) attributes {dimension_semantics = [#tpu.dimension_semantics<parallel>], iteration_bounds = array<i64: 1>, scalar_prefetch = 0 : i64, scratch_operands = 0 : i64, tpu.core_type = #tpu.core_type<tc>, window_params = [{transform_indices = @transform_0, window_bounds = array<i64: 8, 26>}, {pipeline_mode = #tpu.pipeline_mode<synchronous>, transform_indices = @transform_1, window_bounds = array<i64: 26, 1024>}, {pipeline_mode = #tpu.pipeline_mode<synchronous>, transform_indices = @transform_2, window_bounds = array<i64: 1, 1024>}, {pipeline_mode = #tpu.pipeline_mode<synchronous>, transform_indices = @transform_3, window_bounds = array<i64: 1024, 512>}, {pipeline_mode = #tpu.pipeline_mode<synchronous>, transform_indices = @transform_4, window_bounds = array<i64: 1, 512>}, {pipeline_mode = #tpu.pipeline_mode<synchronous>, transform_indices = @transform_5, window_bounds = array<i64: 512, 128>}, {pipeline_mode = #tpu.pipeline_mode<synchronous>, transform_indices = @transform_6, window_bounds = array<i64: 1, 128>}, {transform_indices = @transform_7, window_bounds = array<i64: 8, 128>}]} {
    %c0 = arith.constant 0 : index
    %c0_0 = arith.constant 0 : index
    %0 = vector.load %arg1[%c0, %c0_0] : memref<8x26xf32, #tpu.memory_space<vmem>>, vector<8x26xf32>
    %c0_1 = arith.constant 0 : index
    %c0_2 = arith.constant 0 : index
    %1 = vector.load %arg2[%c0_1, %c0_2] : memref<26x1024xf32, #tpu.memory_space<vmem>>, vector<26x1024xf32>
    %cst = arith.constant dense<0.000000e+00> : vector<8x1024xf32>
    %2 = tpu.matmul %0, %1, %cst {dimension_numbers = #tpu.dot_dimension_numbers<[1], [0], [0], [1], [0, 0, 1, 1], [], []>} : vector<8x26xf32>, vector<26x1024xf32>, vector<8x1024xf32> -> vector<8x1024xf32>
    %c0_3 = arith.constant 0 : index
    %c0_4 = arith.constant 0 : index
    %3 = vector.load %arg3[%c0_3, %c0_4] : memref<1x1024xf32, #tpu.memory_space<vmem>>, vector<1x1024xf32>
    %4 = vector.broadcast %3 : vector<1x1024xf32> to vector<8x1024xf32>
    %5 = arith.addf %2, %4 : vector<8x1024xf32>
    %6 = math.tanh %5 : vector<8x1024xf32>
    %7 = arith.truncf %6 : vector<8x1024xf32> to vector<8x1024xbf16>
    %c0_5 = arith.constant 0 : index
    %c0_6 = arith.constant 0 : index
    %8 = vector.load %arg4[%c0_5, %c0_6] : memref<1024x512xbf16, #tpu.memory_space<vmem>>, vector<1024x512xbf16>
    %cst_7 = arith.constant dense<0.000000e+00> : vector<8x512xf32>
    %9 = tpu.matmul %7, %8, %cst_7 {dimension_numbers = #tpu.dot_dimension_numbers<[1], [0], [0], [1], [0, 0, 1, 1], [], []>} : vector<8x1024xbf16>, vector<1024x512xbf16>, vector<8x512xf32> -> vector<8x512xf32>
    %c0_8 = arith.constant 0 : index
    %c0_9 = arith.constant 0 : index
    %10 = vector.load %arg5[%c0_8, %c0_9] : memref<1x512xf32, #tpu.memory_space<vmem>>, vector<1x512xf32>
    %11 = vector.broadcast %10 : vector<1x512xf32> to vector<8x512xf32>
    %12 = arith.addf %9, %11 : vector<8x512xf32>
    %13 = math.tanh %12 : vector<8x512xf32>
    %14 = arith.truncf %13 : vector<8x512xf32> to vector<8x512xbf16>
    %c0_10 = arith.constant 0 : index
    %c0_11 = arith.constant 0 : index
    %15 = vector.load %arg6[%c0_10, %c0_11] : memref<512x128xbf16, #tpu.memory_space<vmem>>, vector<512x128xbf16>
    %cst_12 = arith.constant dense<0.000000e+00> : vector<8x128xf32>
    %16 = tpu.matmul %14, %15, %cst_12 {dimension_numbers = #tpu.dot_dimension_numbers<[1], [0], [0], [1], [0, 0, 1, 1], [], []>} : vector<8x512xbf16>, vector<512x128xbf16>, vector<8x128xf32> -> vector<8x128xf32>
    %c0_13 = arith.constant 0 : index
    %c0_14 = arith.constant 0 : index
    %17 = vector.load %arg7[%c0_13, %c0_14] : memref<1x128xf32, #tpu.memory_space<vmem>>, vector<1x128xf32>
    %18 = vector.broadcast %17 : vector<1x128xf32> to vector<8x128xf32>
    %19 = arith.addf %16, %18 : vector<8x128xf32>
    %cst_15 = arith.constant dense<0xFF800000> : vector<8xf32>
    %20 = vector.multi_reduction <maximumf>, %19, %cst_15 [1] : vector<8x128xf32> to vector<8xf32>
    %21 = vector.shape_cast %20 : vector<8xf32> to vector<8x1xf32>
    %22 = vector.broadcast %21 : vector<8x1xf32> to vector<8x128xf32>
    %23 = arith.subf %19, %22 : vector<8x128xf32>
    %24 = math.exp %23 : vector<8x128xf32>
    %cst_16 = arith.constant dense<0.000000e+00> : vector<8xf32>
    %25 = vector.multi_reduction <add>, %24, %cst_16 [1] : vector<8x128xf32> to vector<8xf32>
    %26 = vector.shape_cast %25 : vector<8xf32> to vector<8x1xf32>
    %27 = vector.broadcast %26 : vector<8x1xf32> to vector<8x128xf32>
    %28 = arith.divf %24, %27 : vector<8x128xf32>
    %c0_17 = arith.constant 0 : index
    %c0_18 = arith.constant 0 : index
    %29 = vector.load %arg8[%c0_17, %c0_18] : memref<8x128xf32, #tpu.memory_space<vmem>>, vector<8x128xf32>
    tpu.vector_store %arg8[%c0_17, %c0_18], %28 {strides = array<i32>} : memref<8x128xf32, #tpu.memory_space<vmem>>, vector<8x128xf32>,
    return
  }
  func.func @transform_0(%arg0: i32) -> (i32, i32) {
    %c0_i32 = arith.constant 0 : i32
    %c0_i32_0 = arith.constant 0 : i32
    return %arg0, %c0_i32 : i32, i32
  }
  func.func @transform_1(%arg0: i32) -> (i32, i32) {
    %c0_i32 = arith.constant 0 : i32
    %c0_i32_0 = arith.constant 0 : i32
    %c0_i32_1 = arith.constant 0 : i32
    return %c0_i32, %c0_i32_0 : i32, i32
  }
  func.func @transform_2(%arg0: i32) -> (i32, i32) {
    %c0_i32 = arith.constant 0 : i32
    %c0_i32_0 = arith.constant 0 : i32
    %c0_i32_1 = arith.constant 0 : i32
    return %c0_i32, %c0_i32_0 : i32, i32
  }
  func.func @transform_3(%arg0: i32) -> (i32, i32) {
    %c0_i32 = arith.constant 0 : i32
    %c0_i32_0 = arith.constant 0 : i32
    %c0_i32_1 = arith.constant 0 : i32
    return %c0_i32, %c0_i32_0 : i32, i32
  }
  func.func @transform_4(%arg0: i32) -> (i32, i32) {
    %c0_i32 = arith.constant 0 : i32
    %c0_i32_0 = arith.constant 0 : i32
    %c0_i32_1 = arith.constant 0 : i32
    return %c0_i32, %c0_i32_0 : i32, i32
  }
  func.func @transform_5(%arg0: i32) -> (i32, i32) {
    %c0_i32 = arith.constant 0 : i32
    %c0_i32_0 = arith.constant 0 : i32
    %c0_i32_1 = arith.constant 0 : i32
    return %c0_i32, %c0_i32_0 : i32, i32
  }
  func.func @transform_6(%arg0: i32) -> (i32, i32) {
    %c0_i32 = arith.constant 0 : i32
    %c0_i32_0 = arith.constant 0 : i32
    %c0_i32_1 = arith.constant 0 : i32
    return %c0_i32, %c0_i32_0 : i32, i32
  }
  func.func @transform_7(%arg0: i32) -> (i32, i32) {
    %c0_i32 = arith.constant 0 : i32
    %c0_i32_0 = arith.constant 0 : i32
    return %arg0, %c0_i32 : i32, i32
  }
}

</mosaic_0001>

<bundles_post_ra>
// kernel: actor_forward.1
= control target key start
LH: loop header
LB: loop body
LE: loop exit
PB: predicated region body
PF: predicated region fallthrough
CT: control target
= control target key end

     0   :  { %12 = vsyncpa [#allocation3], 0  ;;  %s3983_s0 = inlined_call_operand.hbm [shape: f32[8,26], index: 0, kind: input, shape index: {}]   ;;  %s3984_s1 = inlined_call_operand.hbm [shape: f32[26,1024], index: 1, kind: input, shape index: {}]   ;;  %s3985_s2 = inlined_call_operand.hbm [shape: f32[1,1024], index: 2, kind: input, shape index: {}]   ;;  %s3986_s3 = inlined_call_operand.hbm [shape: bf16[1024,512], index: 3, kind: input, shape index: {}]   ;;  %s3987_s4 = inlined_call_operand.vmem [shape: f32[1,512], index: 4, kind: input, shape index: {}]   ;;  %s3988_s5 = inlined_call_operand.hbm [shape: bf16[512,128], index: 5, kind: input, shape index: {}]   ;;  %s3989_s6 = inlined_call_operand.vmem [shape: f32[1,128], index: 6, kind: input, shape index: {}]   ;;  %s3990_s7 = inlined_call_operand.hbm [shape: f32[8,128], index: 7, kind: output, shape index: {}]  }
   0x1   :  { %13 = vsyncpa [#allocation6], 0 }
   0x2   :  { %14 = vsyncpa [#allocation9], 0 }
   0x3   :  { %15 = vsyncpa [#allocation4], 0  ;;  %s3770_s24 = smov [#allocation5]   ;;  %s3630_s28 = scalar_lea.hbm %s3984_s1, 4096 }
   0x4   :  { %s31_s25 = sshll.u32 %s3770_s24, 4  ;;  %p3631_p0 = scmp.ne.s32.totalorder %s3984_s1, %s3630_s28  ;;  %s32_s25 = int_to_ptr.vmem [resolvable:$true] %s31_s25 }
   0x5   :  { %p3634_p1 = scmp.lt.u32.totalorder %s3630_s28, %s3984_s1 }
   0x7   :  { %p3636_p2 = pnand %p3634_p1, %p3631_p0 }
   0x9   :  { %3639 = shalt.err (!%p3636_p2)
}
   0xa   :  { %s3640_s10 = scalar_lea.vmem %s32_s25, 4096  ;;  %p3645_p4 = scmp.lt.s32.totalorder %s32_s25, %s32_s25 }
   0xb   :  { %p3641_p3 = scmp.ne.s32.totalorder %s32_s25, %s3640_s10  ;;  %p3646_p5 = scmp.lt.s32.totalorder %s3640_s10, %s3640_s10 }
   0xd   :  { %p3647_p6 = por %p3646_p5, %p3645_p4 }
   0xf   :  { %p3648_p7 = pnand %p3647_p6, %p3641_p3 }
  0x11   :  { %3651 = shalt.err (!%p3648_p7)
}
  0x12   :  { %s3771_s11 = smov 1024   ;;  %s3772_s12 = smov 64  }
  0x13   :  { %37 = dma.hbm_to_vmem [thread:$0]  %s3984_s1, 4096, %s32_s25, [#allocation6], %s3771_s11, %s3771_s11, %s3772_s12  }
  0x14   :  { %s3773_s15 = smov [#allocation8]   ;;  %s3652_s19 = scalar_lea.hbm %s3986_s3, 32768 }
  0x15   :  { %s53_s16 = sshll.u32 %s3773_s15, 4  ;;  %p3653_p8 = scmp.ne.s32.totalorder %s3986_s3, %s3652_s19  ;;  %s54_s16 = int_to_ptr.vmem [resolvable:$true] %s53_s16 }
  0x16   :  { %p3656_p9 = scmp.lt.u32.totalorder %s3652_s19, %s3986_s3 }
  0x18   :  { %p3658_p10 = pnand %p3656_p9, %p3653_p8 }
  0x1a   :  { %3661 = shalt.err (!%p3658_p10)
}
  0x1b   :  { %s3662_s24 = scalar_lea.vmem %s54_s16, 32768  ;;  %p3667_p12 = scmp.lt.s32.totalorder %s54_s16, %s54_s16 }
  0x1c   :  { %p3663_p11 = scmp.ne.s32.totalorder %s54_s16, %s3662_s24  ;;  %p3668_p13 = scmp.lt.s32.totalorder %s3662_s24, %s3662_s24 }
  0x1e   :  { %p3669_p0 = por %p3668_p13, %p3667_p12 }
  0x20   :  { %p3670_p1 = pnand %p3669_p0, %p3663_p11 }
  0x22   :  { %3673 = shalt.err (!%p3670_p1)
}
  0x23   :  { %s3774_s1 = smov 256   ;;  %s3775_s25 = smov 16  }
  0x24   :  { %59 = dma.hbm_to_vmem [thread:$0]  %s3986_s3, 32768, %s54_s16, [#allocation9], %s3774_s1, %s3774_s1, %s3775_s25  }
  0x25   :  { %s3776_s28 = smov [#allocation2]   ;;  %s3777_s30 = smov [#allocation7]  }
  0x26   :  { %s22_s29 = sshll.u32 %s3776_s28, 4  ;;  %s44_s8 = sshll.u32 %s3777_s30, 4  ;;  %s23_s29 = int_to_ptr.vmem [resolvable:$true] %s22_s29  ;;  %s45_s8 = int_to_ptr.vmem [resolvable:$true] %s44_s8 }
  0x27   :  { %s3674_s11 = scalar_lea.hbm %s3983_s0, 128 }
  0x28   :  { %p3675_p2 = scmp.ne.s32.totalorder %s3983_s0, %s3674_s11  ;;  %p3678_p3 = scmp.lt.u32.totalorder %s3674_s11, %s3983_s0 }
  0x2a   :  { %p3680_p4 = pnand %p3678_p3, %p3675_p2 }
  0x2c   :  { %3683 = shalt.err (!%p3680_p4)
}
  0x2d   :  { %s3684_s3 = scalar_lea.vmem %s23_s29, 128  ;;  %p3689_p6 = scmp.lt.s32.totalorder %s23_s29, %s23_s29 }
  0x2e   :  { %p3685_p5 = scmp.ne.s32.totalorder %s23_s29, %s3684_s3  ;;  %p3690_p7 = scmp.lt.s32.totalorder %s3684_s3, %s3684_s3 }
  0x30   :  { %p3691_p8 = por %p3690_p7, %p3689_p6 }
  0x32   :  { %p3692_p9 = pnand %p3691_p8, %p3685_p5 }
  0x34   :  { %3695 = shalt.err (!%p3692_p9)
}
  0x35   :  { %25 = dma.hbm_to_vmem [thread:$0]  %s3983_s0, 128, %s23_s29, [#allocation3]  }
  0x36   :  { %s3696_s21 = scalar_lea.hbm %s3985_s2, 128 }
  0x37   :  { %p3697_p10 = scmp.ne.s32.totalorder %s3985_s2, %s3696_s21  ;;  %p3700_p11 = scmp.lt.u32.totalorder %s3696_s21, %s3985_s2 }
  0x39   :  { %p3702_p12 = pnand %p3700_p11, %p3697_p10 }
  0x3b   :  { %3705 = shalt.err (!%p3702_p12)
}
  0x3c   :  { %s3706_s25 = scalar_lea.vmem %s45_s8, 128  ;;  %p3711_p0 = scmp.lt.s32.totalorder %s45_s8, %s45_s8 }
  0x3d   :  { %p3707_p13 = scmp.ne.s32.totalorder %s45_s8, %s3706_s25  ;;  %p3712_p1 = scmp.lt.s32.totalorder %s3706_s25, %s3706_s25 }
  0x3f   :  { %p3713_p2 = por %p3712_p1, %p3711_p0 }
  0x41   :  { %p3714_p3 = pnand %p3713_p2, %p3707_p13 }
  0x43   :  { %3717 = shalt.err (!%p3714_p3)
}
  0x44   :  { %47 = dma.hbm_to_vmem [thread:$0]  %s3985_s2, 128, %s45_s8, [#allocation6]  }
  0x45   :  { %s3778_s27 = smov [#allocation10]   ;;  %s3718_s9 = scalar_lea.hbm %s3988_s5, 4096 }
  0x46   :  { %s67_s28 = sshll.u32 %s3778_s27, 4  ;;  %p3719_p4 = scmp.ne.s32.totalorder %s3988_s5, %s3718_s9  ;;  %s68_s28 = int_to_ptr.vmem [resolvable:$true] %s67_s28 }
  0x47   :  { %p3722_p5 = scmp.lt.u32.totalorder %s3718_s9, %s3988_s5 }
  0x49   :  { %p3724_p6 = pnand %p3722_p5, %p3719_p4 }
  0x4b   :  { %3727 = shalt.err (!%p3724_p6)
}
  0x4c   :  { %s3728_s15 = scalar_lea.vmem %s68_s28, 4096  ;;  %p3733_p8 = scmp.lt.s32.totalorder %s68_s28, %s68_s28 }
  0x4d   :  { %p3729_p7 = scmp.ne.s32.totalorder %s68_s28, %s3728_s15  ;;  %p3734_p9 = scmp.lt.s32.totalorder %s3728_s15, %s3728_s15 }
  0x4f   :  { %p3735_p10 = por %p3734_p9, %p3733_p8 }
  0x51   :  { %p3736_p11 = pnand %p3735_p10, %p3729_p7 }
  0x53   :  { %3739 = shalt.err (!%p3736_p11)
}
  0x54   :  { %s3779_s2 = smov 4  }
  0x55   :  { %73 = dma.hbm_to_vmem [thread:$0]  %s3988_s5, 4096, %s68_s28, [#allocation9], %s3772_s12, %s3772_s12, %s3779_s2  }
  0x56   :  { %3762 = dma.done.wait [#allocation3], 128  }
  0x57   :  { %3763 = vsyncadd [#allocation3], 4294967168 }
  0x58   :  { %3764 = dma.done.wait [#allocation6], 4224  }
  0x59   :  { %3765 = vsyncadd [#allocation6], 4294963072 }
  0x5a   :  { %3766 = dma.done.wait [#allocation9], 36864  }
  0x5b   :  { %3767 = vsyncadd [#allocation9], 4294930432  ;;  %v3780_v0 = vmov 0.0   ;;  %vm171_vm0 = vcmask 1041408   ;;  %v94_v1 = vld [vmem:[#allocation5 + $0x8] sm:$0xff]  ;;  %v93_v3 = vld [vmem:[#allocation5] sm:$0xff] }
  0x5c   :  { %260 = vmatprep.mubr.f32.mxu0 %v3780_v0  ;;  %331 = vmatprep.mubr.f32.mxu1 %v3780_v0  ;;  %v102_v2 = vld [vmem:[#allocation5 + $0x48] sm:$0xff]  ;;  %v101_v5 = vld [vmem:[#allocation5 + $0x40] sm:$0xff]  ;;  %vm3781_vm1 = vmmov 1   ;;  %v96_v13 = vld [vmem:[#allocation5 + $0x18] sm:$0xff]  ;;  %vm167_vm3 = vcmask 211968  }
  0x5d   :  { %v3105_v4 = vpack.c.bf16 %v102_v2, %v94_v1  ;;  %v110_v6 = vld [vmem:[#allocation5 + $0x88] sm:$0xff]  ;;  %v3107_v8 = vpack.c.bf16 %v101_v5, %v93_v3  ;;  %vm3888_vm2 = vmpackc.low %vm171_vm0, %vm3781_vm1  ;;  %v109_v11 = vld [vmem:[#allocation5 + $0x80] sm:$0xff] }
  0x5e   :  { %v118_v7 = vld [vmem:[#allocation5 + $0xc8] sm:$0x3]  ;;  %v117_v12 = vld [vmem:[#allocation5 + $0xc0] sm:$0x3]  ;;  %v104_v14 = vld [vmem:[#allocation5 + $0x58] sm:$0xff] }
  0x5f   :  { %v3109_v9 = vpack.c.bf16 %v118_v7, %v110_v6  ;;  %3106 = vmatprep.subr.bf16.mxu0 %v3105_v4  ;;  %v95_v15 = vld [vmem:[#allocation5 + $0x10] sm:$0xff]  ;;  %v3112_v16 = vpack.c.bf16 %v117_v12, %v109_v11  ;;  %v3115_v17 = vpack.c.bf16 %v104_v14, %v96_v13  ;;  %v112_v19 = vld [vmem:[#allocation5 + $0x98] sm:$0xff]  ;;  %v98_v25 = vld [vmem:[#allocation5 + $0x28] sm:$0xff] }
  0x60   :  { %3108 = vmatpush1.bf16.msra.mxu0 %v3107_v8  ;;  %v103_v18 = vld [vmem:[#allocation5 + $0x50] sm:$0xff]  ;;  %v120_v20 = vld [vmem:[#allocation5 + $0xd8] sm:$0x3]  ;;  %v106_v27 = vld [vmem:[#allocation5 + $0x68] sm:$0xff] }
  0x61   :  { %3111 = vmatprep.subr.msk.bf16.mxu0 %vm3888_vm2, %v3109_v9  ;;  %v3117_v21 = vpack.c.bf16 %v103_v18, %v95_v15  ;;  %v3119_v22 = vpack.c.bf16 %v120_v20, %v112_v19  ;;  %v111_v23 = vld [vmem:[#allocation5 + $0x90] sm:$0xff]  ;;  %v92_v26 = vld [vmem:[#allocation2] sm:$0xff]  ;;  %3116 = vmatprep.subr.bf16.mxu1 %v3115_v17  ;;  %v97_v28 = vld [vmem:[#allocation5 + $0x20] sm:$0xff]  ;;  %v3125_v31 = vpack.c.bf16 %v106_v27, %v98_v25 }
  0x62   :  { %v119_v24 = vld [vmem:[#allocation5 + $0xd0] sm:$0x3]  ;;  %v105_v29 = vld [vmem:[#allocation5 + $0x60] sm:$0xff]  ;;  %v114_v32 = vld [vmem:[#allocation5 + $0xa8] sm:$0xff] }
  0x63   :  { %3118 = vmatpush1.bf16.msra.mxu1 %v3117_v21  ;;  %v3122_v30 = vpack.c.bf16 %v119_v24, %v111_v23  ;;  %v122_v33 = vld [vmem:[#allocation5 + $0xe8] sm:$0x3]  ;;  %v113_v34 = vld [vmem:[#allocation5 + $0xa0] sm:$0xff]  ;;  %v3127_v35 = vpack.c.bf16 %v105_v29, %v97_v28  ;;  %v100_v37 = vld [vmem:[#allocation5 + $0x38] sm:$0xff] }
  0x64   :  { %3114 = vmatpush1.bf16.msk.msra.mxu0 %vm3888_vm2, %v3112_v16  ;;  %3121 = vmatprep.subr.msk.bf16.mxu1 %vm3888_vm2, %v3119_v22  ;;  %v121_v36 = vld [vmem:[#allocation5 + $0xe0] sm:$0x3]  ;;  %v108_v38 = vld [vmem:[#allocation5 + $0x78] sm:$0xff]  ;;  %v3129_v39 = vpack.c.bf16 %v122_v33, %v114_v32  ;;  %v99_v41 = vld [vmem:[#allocation5 + $0x30] sm:$0xff] }
  0x65   :  { %3126 = vmatprep.subr.bf16.mxu0 %v3125_v31  ;;  %v3135_v40 = vpack.c.bf16 %v108_v38, %v100_v37  ;;  %v107_v42 = vld [vmem:[#allocation5 + $0x70] sm:$0xff]  ;;  %v116_v43 = vld [vmem:[#allocation5 + $0xb8] sm:$0xff]  ;;  %v3132_v47 = vpack.c.bf16 %v121_v36, %v113_v34 }
  0x66   :  { %v124_v44 = vld [vmem:[#allocation5 + $0xf8] sm:$0x3]  ;;  %v3137_v45 = vpack.c.bf16 %v107_v42, %v99_v41  ;;  %v115_v46 = vld [vmem:[#allocation5 + $0xb0] sm:$0xff]  ;;  %v3188_v50 = vld [vmem:[#allocation8 + $0x4] ss:$16 sps:$4 sm:$0xff]  }
  0x67   :  { %2762 = vmatmul.mubr.msk.f32.vlgmr.msra.gmra.mrb[0].mxu0 %vm167_vm3, %v92_v26  ;;  %3124 = vmatpush1.bf16.msk.msra.mxu1 %vm3888_vm2, %v3122_v30  ;;  %v3139_v48 = vpack.c.bf16 %v124_v44, %v116_v43  ;;  %v123_v49 = vld [vmem:[#allocation5 + $0xf0] sm:$0x3]  ;;  %v3186_v52 = vld [vmem:[#allocation8] ss:$16 sps:$4 sm:$0xff]   ;;  %v3191_v53 = vld [vmem:[#allocation8 + $0xc] ss:$16 sps:$4 sm:$0xff]  }
  0x68   :  { %3128 = vmatpush1.bf16.msra.mxu0 %v3127_v35  ;;  %402 = vmatprep.mubr.f32.mxu0 %v3780_v0  ;;  %v3142_v51 = vpack.c.bf16 %v123_v49, %v115_v46  ;;  %v3194_v54 = vld [vmem:[#allocation8 + $0x24] ss:$16 sps:$4 sm:$0xff]   ;;  %v3189_v55 = vld [vmem:[#allocation8 + $0x8] ss:$16 sps:$4 sm:$0xff]   ;;  %v3192_v56 = vld [vmem:[#allocation8 + $0x20] ss:$16 sps:$4 sm:$0xff]  }
  0x69   :  { %3131 = vmatprep.subr.msk.bf16.mxu0 %vm3888_vm2, %v3129_v39  ;;  %3136 = vmatprep.subr.bf16.mxu1 %v3135_v40  ;;  %v3197_v57 = vld [vmem:[#allocation8 + $0x2c] ss:$16 sps:$4 sm:$0xff]   ;;  %v3200_v58 = vld [vmem:[#allocation8 + $0x44] ss:$16 sps:$4 sm:$0xff]   ;;  %v3195_v59 = vld [vmem:[#allocation8 + $0x28] ss:$16 sps:$4 sm:$0xff]  }
  0x6a   :  { %2765 = vmatmul.mubr.msk.f32.vlgmr.msra.gmra.mrb[0].mxu1 %vm167_vm3, %v92_v26  ;;  %v3198_v60 = vld [vmem:[#allocation8 + $0x40] ss:$16 sps:$4 sm:$0xff]   ;;  %v3203_v61 = vld [vmem:[#allocation8 + $0x4c] ss:$16 sps:$4 sm:$0xff]   ;;  %v3206_v62 = vld [vmem:[#allocation8 + $0x64] ss:$16 sps:$4 sm:$0xff]  }
  0x6b   :  { %3138 = vmatpush1.bf16.msra.mxu1 %v3137_v45  ;;  %473 = vmatprep.mubr.f32.mxu1 %v3780_v0  ;;  %v3201_v63 = vld [vmem:[#allocation8 + $0x48] ss:$16 sps:$4 sm:$0xff]   ;;  %v3204_v0 = vld [vmem:[#allocation8 + $0x60] ss:$16 sps:$4 sm:$0xff]   ;;  %v3209_v1 = vld [vmem:[#allocation8 + $0x6c] ss:$16 sps:$4 sm:$0xff]  }
  0x6c   :  { %3134 = vmatpush1.bf16.msk.msra.mxu0 %vm3888_vm2, %v3132_v47  ;;  %3141 = vmatprep.subr.msk.bf16.mxu1 %vm3888_vm2, %v3139_v48  ;;  %v3212_v2 = vld [vmem:[#allocation8 + $0x84] ss:$16 sps:$4 sm:$0xff]   ;;  %v3207_v3 = vld [vmem:[#allocation8 + $0x68] ss:$16 sps:$4 sm:$0xff]   ;;  %v3210_v4 = vld [vmem:[#allocation8 + $0x80] ss:$16 sps:$4 sm:$0xff]  }
  0x6d   :  { %2054 = vmatprep.subr.bf16.mxu0 %v3188_v50  ;;  %v3215_v5 = vld [vmem:[#allocation8 + $0x8c] ss:$16 sps:$4 sm:$0xff]   ;;  %v3218_v6 = vld [vmem:[#allocation8 + $0xa4] ss:$16 sps:$4 sm:$0xff]   ;;  %v3213_v7 = vld [vmem:[#allocation8 + $0x88] ss:$16 sps:$4 sm:$0xff]  }
  0x6e   :  { %v3216_v8 = vld [vmem:[#allocation8 + $0xa0] ss:$16 sps:$4 sm:$0xff]   ;;  %v3221_v9 = vld [vmem:[#allocation8 + $0xac] ss:$16 sps:$4 sm:$0xff]   ;;  %v3224_v10 = vld [vmem:[#allocation8 + $0xc4] ss:$16 sps:$4 sm:$0xff]  }
  0x6f   :  { %2768 = vmatmul.mubr.msk.f32.vlgmr.msra.gmra.mrb[2].mxu0 %vm167_vm3, %v92_v26  ;;  %3144 = vmatpush1.bf16.msk.msra.mxu1 %vm3888_vm2, %v3142_v51  ;;  %v3219_v11 = vld [vmem:[#allocation8 + $0xa8] ss:$16 sps:$4 sm:$0xff]   ;;  %v3222_v12 = vld [vmem:[#allocation8 + $0xc0] ss:$16 sps:$4 sm:$0xff]   ;;  %v3227_v13 = vld [vmem:[#allocation8 + $0xcc] ss:$16 sps:$4 sm:$0xff]  }
  0x70   :  { %2218 = vmatprep.subr.bf16.mxu1 %v3191_v53  ;;  %2055 = vmatpush1.bf16.msra.mxu0 %v3186_v52  ;;  %v3225_v14 = vld [vmem:[#allocation8 + $0xc8] ss:$16 sps:$4 sm:$0xff]   ;;  %v3230_v15 = vld [vmem:[#allocation8 + $0xe4] ss:$16 sps:$4 sm:$0xff]   ;;  %v3228_v16 = vld [vmem:[#allocation8 + $0xe0] ss:$16 sps:$4 sm:$0xff]   ;;  %v127_v53 = vlaneseq }
  0x71   :  { %2056 = vmatprep.subr.bf16.mxu0 %v3194_v54  ;;  %v3233_v17 = vld [vmem:[#allocation8 + $0xec] ss:$16 sps:$4 sm:$0xff]   ;;  %v3236_v18 = vld [vmem:[#allocation8 + $0x104] ss:$16 sps:$4 sm:$0xff]   ;;  %v3231_v19 = vld [vmem:[#allocation8 + $0xe8] ss:$16 sps:$4 sm:$0xff]  }
  0x72   :  { %2771 = vmatmul.mubr.msk.f32.vlgmr.msra.gmra.mrb[2].mxu1 %vm167_vm3, %v92_v26  ;;  %v3234_v20 = vld [vmem:[#allocation8 + $0x100] ss:$16 sps:$4 sm:$0xff]   ;;  %v3239_v21 = vld [vmem:[#allocation8 + $0x10c] ss:$16 sps:$4 sm:$0xff]   ;;  %v3242_v22 = vld [vmem:[#allocation8 + $0x124] ss:$16 sps:$4 sm:$0xff]  }
  0x73   :  { %2219 = vmatpush1.bf16.msra.mxu1 %v3189_v55  ;;  %v3237_v23 = vld [vmem:[#allocation8 + $0x108] ss:$16 sps:$4 sm:$0xff]   ;;  %v3240_v24 = vld [vmem:[#allocation8 + $0x120] ss:$16 sps:$4 sm:$0xff]   ;;  %v3245_v25 = vld [vmem:[#allocation8 + $0x12c] ss:$16 sps:$4 sm:$0xff]  }
  0x74   :  { %2220 = vmatprep.subr.bf16.mxu1 %v3197_v57  ;;  %2057 = vmatpush1.bf16.msra.mxu0 %v3192_v56  ;;  %v3248_v26 = vld [vmem:[#allocation8 + $0x144] ss:$16 sps:$4 sm:$0xff]   ;;  %v3243_v27 = vld [vmem:[#allocation8 + $0x128] ss:$16 sps:$4 sm:$0xff]   ;;  %v3246_v28 = vld [vmem:[#allocation8 + $0x140] ss:$16 sps:$4 sm:$0xff]  }
  0x75   :  { %2058 = vmatprep.subr.bf16.mxu0 %v3200_v58  ;;  %v3251_v29 = vld [vmem:[#allocation8 + $0x14c] ss:$16 sps:$4 sm:$0xff]   ;;  %v3254_v30 = vld [vmem:[#allocation8 + $0x164] ss:$16 sps:$4 sm:$0xff]   ;;  %v3249_v31 = vld [vmem:[#allocation8 + $0x148] ss:$16 sps:$4 sm:$0xff]  }
  0x76   :  { %v3252_v32 = vld [vmem:[#allocation8 + $0x160] ss:$16 sps:$4 sm:$0xff]   ;;  %v3257_v33 = vld [vmem:[#allocation8 + $0x16c] ss:$16 sps:$4 sm:$0xff]   ;;  %v3255_v34 = vld [vmem:[#allocation8 + $0x168] ss:$16 sps:$4 sm:$0xff]  }
  0x77   :  { %2221 = vmatpush1.bf16.msra.mxu1 %v3195_v59  ;;  %v3260_v35 = vld [vmem:[#allocation8 + $0x184] ss:$16 sps:$4 sm:$0xff]   ;;  %v3263_v36 = vld [vmem:[#allocation8 + $0x18c] ss:$16 sps:$4 sm:$0xff]   ;;  %v3258_v37 = vld [vmem:[#allocation8 + $0x180] ss:$16 sps:$4 sm:$0xff]  }
  0x78   :  { %2222 = vmatprep.subr.bf16.mxu1 %v3203_v61  ;;  %2059 = vmatpush1.bf16.msra.mxu0 %v3198_v60  ;;  %v3261_v38 = vld [vmem:[#allocation8 + $0x188] ss:$16 sps:$4 sm:$0xff]   ;;  %v3266_v39 = vld [vmem:[#allocation8 + $0x1a4] ss:$16 sps:$4 sm:$0xff]   ;;  %v3269_v40 = vld [vmem:[#allocation8 + $0x1ac] ss:$16 sps:$4 sm:$0xff]  }
  0x79   :  { %2060 = vmatprep.subr.bf16.mxu0 %v3206_v62  ;;  %v3264_v41 = vld [vmem:[#allocation8 + $0x1a0] ss:$16 sps:$4 sm:$0xff]   ;;  %v3267_v42 = vld [vmem:[#allocation8 + $0x1a8] ss:$16 sps:$4 sm:$0xff]   ;;  %v3272_v43 = vld [vmem:[#allocation8 + $0x1c4] ss:$16 sps:$4 sm:$0xff]  }
  0x7a   :  { %v3275_v44 = vld [vmem:[#allocation8 + $0x1cc] ss:$16 sps:$4 sm:$0xff]   ;;  %v3270_v45 = vld [vmem:[#allocation8 + $0x1c0] ss:$16 sps:$4 sm:$0xff]   ;;  %v3273_v46 = vld [vmem:[#allocation8 + $0x1c8] ss:$16 sps:$4 sm:$0xff]  }
  0x7b   :  { %2223 = vmatpush1.bf16.msra.mxu1 %v3201_v63  ;;  %v3278_v47 = vld [vmem:[#allocation8 + $0x1e4] ss:$16 sps:$4 sm:$0xff]   ;;  %v3281_v48 = vld [vmem:[#allocation8 + $0x1ec] ss:$16 sps:$4 sm:$0xff]   ;;  %v3276_v49 = vld [vmem:[#allocation8 + $0x1e0] ss:$16 sps:$4 sm:$0xff]  }
  0x7c   :  { %2224 = vmatprep.subr.bf16.mxu1 %v3209_v1  ;;  %2061 = vmatpush1.bf16.msra.mxu0 %v3204_v0  ;;  %v3279_v50 = vld [vmem:[#allocation8 + $0x1e8] ss:$16 sps:$4 sm:$0xff]   ;;  %v3284_v51 = vld [vmem:[#allocation8 + $0x204] ss:$16 sps:$4 sm:$0xff]   ;;  %v3287_v52 = vld [vmem:[#allocation8 + $0x20c] ss:$16 sps:$4 sm:$0xff]  }
  0x7d   :  { %2062 = vmatprep.subr.bf16.mxu0 %v3212_v2  ;;  %v3914_v54 = vshrl.u32 %v127_v53, 7  ;;  %v3917_v56 = vld [vmem:[#allocation7] sm:$0xff]  ;;  %v3344_v53 = vld [vmem:[#allocation8 + $0x344] ss:$16 sps:$4 sm:$0xff]  }
  0x7f   :  { %2225 = vmatpush1.bf16.msra.mxu1 %v3207_v3  ;;  %v129_v55 = vsub.s32 0, %v3914_v54  ;;  %v133_v57 = vsub.s32 1, %v3914_v54  ;;  %v141_v59 = vsub.s32 3, %v3914_v54 }
  0x80   :  { %2226 = vmatprep.subr.bf16.mxu1 %v3215_v5  ;;  %2063 = vmatpush1.bf16.msra.mxu0 %v3210_v4 }
  0x81   :  { %2064 = vmatprep.subr.bf16.mxu0 %v3218_v6  ;;  %v130_v58 = vrot.slane %v3917_v56, %v129_v55  ;;  %v134_v60 = vrot.slane %v3917_v56, %v133_v57  ;;  %v142_v0 = vrot.slane %v3917_v56, %v141_v59 }
  0x83   :  { %2227 = vmatpush1.bf16.msra.mxu1 %v3213_v7 }
  0x84   :  { %2228 = vmatprep.subr.bf16.mxu1 %v3221_v9  ;;  %2065 = vmatpush1.bf16.msra.mxu0 %v3216_v8 }
  0x85   :  { %2066 = vmatprep.subr.bf16.mxu0 %v3224_v10  ;;  %v3282_v10 = vld [vmem:[#allocation8 + $0x200] ss:$16 sps:$4 sm:$0xff]  }
  0x87   :  { %2229 = vmatpush1.bf16.msra.mxu1 %v3219_v11  ;;  %v3285_v11 = vld [vmem:[#allocation8 + $0x208] ss:$16 sps:$4 sm:$0xff]  }
  0x88   :  { %2230 = vmatprep.subr.bf16.mxu1 %v3227_v13  ;;  %2067 = vmatpush1.bf16.msra.mxu0 %v3222_v12  ;;  %v3290_v13 = vld [vmem:[#allocation8 + $0x224] ss:$16 sps:$4 sm:$0xff]  }
  0x89   :  { %2068 = vmatprep.subr.bf16.mxu0 %v3230_v15 }
  0x8b   :  { %2231 = vmatpush1.bf16.msra.mxu1 %v3225_v14  ;;  %v3293_v14 = vld [vmem:[#allocation8 + $0x22c] ss:$16 sps:$4 sm:$0xff]  }
  0x8c   :  { %2232 = vmatprep.subr.bf16.mxu1 %v3233_v17  ;;  %2069 = vmatpush1.bf16.msra.mxu0 %v3228_v16  ;;  %v3288_v17 = vld [vmem:[#allocation8 + $0x220] ss:$16 sps:$4 sm:$0xff]  }
  0x8d   :  { %2070 = vmatprep.subr.bf16.mxu0 %v3236_v18  ;;  %v3291_v18 = vld [vmem:[#allocation8 + $0x228] ss:$16 sps:$4 sm:$0xff]  }
  0x8f   :  { %2233 = vmatpush1.bf16.msra.mxu1 %v3231_v19  ;;  %v3296_v19 = vld [vmem:[#allocation8 + $0x244] ss:$16 sps:$4 sm:$0xff]  }
  0x90   :  { %2234 = vmatprep.subr.bf16.mxu1 %v3239_v21  ;;  %2071 = vmatpush1.bf16.msra.mxu0 %v3234_v20  ;;  %v3299_v20 = vld [vmem:[#allocation8 + $0x24c] ss:$16 sps:$4 sm:$0xff]   ;;  %v3294_v21 = vld [vmem:[#allocation8 + $0x240] ss:$16 sps:$4 sm:$0xff]  }
  0x91   :  { %2072 = vmatprep.subr.bf16.mxu0 %v3242_v22  ;;  %v3297_v22 = vld [vmem:[#allocation8 + $0x248] ss:$16 sps:$4 sm:$0xff]  }
  0x93   :  { %2235 = vmatpush1.bf16.msra.mxu1 %v3237_v23  ;;  %v3302_v23 = vld [vmem:[#allocation8 + $0x264] ss:$16 sps:$4 sm:$0xff]  }
  0x94   :  { %2236 = vmatprep.subr.bf16.mxu1 %v3245_v25  ;;  %2073 = vmatpush1.bf16.msra.mxu0 %v3240_v24  ;;  %v3305_v24 = vld [vmem:[#allocation8 + $0x26c] ss:$16 sps:$4 sm:$0xff]   ;;  %v3300_v25 = vld [vmem:[#allocation8 + $0x260] ss:$16 sps:$4 sm:$0xff]  }
  0x95   :  { %2074 = vmatprep.subr.bf16.mxu0 %v3248_v26  ;;  %v3303_v26 = vld [vmem:[#allocation8 + $0x268] ss:$16 sps:$4 sm:$0xff]  }
  0x97   :  { %2237 = vmatpush1.bf16.msra.mxu1 %v3243_v27  ;;  %v3308_v27 = vld [vmem:[#allocation8 + $0x284] ss:$16 sps:$4 sm:$0xff]  }
  0x98   :  { %2238 = vmatprep.subr.bf16.mxu1 %v3251_v29  ;;  %2075 = vmatpush1.bf16.msra.mxu0 %v3246_v28  ;;  %v3311_v28 = vld [vmem:[#allocation8 + $0x28c] ss:$16 sps:$4 sm:$0xff]   ;;  %v3306_v29 = vld [vmem:[#allocation8 + $0x280] ss:$16 sps:$4 sm:$0xff]  }
  0x99   :  { %2076 = vmatprep.subr.bf16.mxu0 %v3254_v30  ;;  %v3309_v30 = vld [vmem:[#allocation8 + $0x288] ss:$16 sps:$4 sm:$0xff]  }
  0x9b   :  { %2239 = vmatpush1.bf16.msra.mxu1 %v3249_v31  ;;  %v3314_v31 = vld [vmem:[#allocation8 + $0x2a4] ss:$16 sps:$4 sm:$0xff]  }
  0x9c   :  { %2240 = vmatprep.subr.bf16.mxu1 %v3257_v33  ;;  %2077 = vmatpush1.bf16.msra.mxu0 %v3252_v32  ;;  %v3317_v32 = vld [vmem:[#allocation8 + $0x2ac] ss:$16 sps:$4 sm:$0xff]   ;;  %v3312_v33 = vld [vmem:[#allocation8 + $0x2a0] ss:$16 sps:$4 sm:$0xff]  }
  0x9d   :  { %2078 = vmatprep.subr.bf16.mxu0 %v3260_v35  ;;  %v3320_v35 = vld [vmem:[#allocation8 + $0x2c4] ss:$16 sps:$4 sm:$0xff]  }
  0x9f   :  { %2241 = vmatpush1.bf16.msra.mxu1 %v3255_v34  ;;  %v3315_v34 = vld [vmem:[#allocation8 + $0x2a8] ss:$16 sps:$4 sm:$0xff]  }
  0xa0   :  { %2242 = vmatprep.subr.bf16.mxu1 %v3263_v36  ;;  %2079 = vmatpush1.bf16.msra.mxu0 %v3258_v37  ;;  %v3323_v36 = vld [vmem:[#allocation8 + $0x2cc] ss:$16 sps:$4 sm:$0xff]  }
  0xa1   :  { %2080 = vmatprep.subr.bf16.mxu0 %v3266_v39  ;;  %v3321_v39 = vld [vmem:[#allocation8 + $0x2c8] ss:$16 sps:$4 sm:$0xff]  }
  0xa3   :  { %2243 = vmatpush1.bf16.msra.mxu1 %v3261_v38  ;;  %v3318_v38 = vld [vmem:[#allocation8 + $0x2c0] ss:$16 sps:$4 sm:$0xff]  }
  0xa4   :  { %2244 = vmatprep.subr.bf16.mxu1 %v3269_v40  ;;  %2081 = vmatpush1.bf16.msra.mxu0 %v3264_v41  ;;  %v3326_v41 = vld [vmem:[#allocation8 + $0x2e4] ss:$16 sps:$4 sm:$0xff]  }
  0xa5   :  { %2082 = vmatprep.subr.bf16.mxu0 %v3272_v43  ;;  %v3324_v43 = vld [vmem:[#allocation8 + $0x2e0] ss:$16 sps:$4 sm:$0xff]  }
  0xa7   :  { %2245 = vmatpush1.bf16.msra.mxu1 %v3267_v42  ;;  %v3329_v42 = vld [vmem:[#allocation8 + $0x2ec] ss:$16 sps:$4 sm:$0xff]  }
  0xa8   :  { %2246 = vmatprep.subr.bf16.mxu1 %v3275_v44  ;;  %2083 = vmatpush1.bf16.msra.mxu0 %v3270_v45  ;;  %v3327_v44 = vld [vmem:[#allocation8 + $0x2e8] ss:$16 sps:$4 sm:$0xff]   ;;  %v3332_v45 = vld [vmem:[#allocation8 + $0x304] ss:$16 sps:$4 sm:$0xff]  }
  0xa9   :  { %2084 = vmatprep.subr.bf16.mxu0 %v3278_v47  ;;  %v3330_v47 = vld [vmem:[#allocation8 + $0x300] ss:$16 sps:$4 sm:$0xff]  }
  0xab   :  { %2247 = vmatpush1.bf16.msra.mxu1 %v3273_v46  ;;  %v3335_v46 = vld [vmem:[#allocation8 + $0x30c] ss:$16 sps:$4 sm:$0xff]  }
  0xac   :  { %2248 = vmatprep.subr.bf16.mxu1 %v3281_v48  ;;  %2085 = vmatpush1.bf16.msra.mxu0 %v3276_v49  ;;  %v3333_v48 = vld [vmem:[#allocation8 + $0x308] ss:$16 sps:$4 sm:$0xff]   ;;  %v3338_v49 = vld [vmem:[#allocation8 + $0x324] ss:$16 sps:$4 sm:$0xff]  }
  0xad   :  { %2095 = vmatprep.subr.bf16.mxu0 %v3284_v51  ;;  %v3336_v51 = vld [vmem:[#allocation8 + $0x320] ss:$16 sps:$4 sm:$0xff]  }
  0xaf   :  { %2249 = vmatpush1.bf16.msra.mxu1 %v3279_v50  ;;  %v3341_v50 = vld [vmem:[#allocation8 + $0x32c] ss:$16 sps:$4 sm:$0xff]  }
  0xb0   :  { %2259 = vmatprep.subr.bf16.mxu1 %v3287_v52  ;;  %v3339_v52 = vld [vmem:[#allocation8 + $0x328] ss:$16 sps:$4 sm:$0xff]  }
 0x13a   :  { %v262_v61 = vpop.f32.mrb[0].mxu0 }
 0x13b   :  { %v263_v62 = vadd.f32 %v262_v61, %v130_v58  ;;  %v264_v63 = vpop.f32.mrb[1].mxu0  ;;  %v3347_v58 = vld [vmem:[#allocation8 + $0x34c] ss:$16 sps:$4 sm:$0xff]   ;;  %v3342_v61 = vld [vmem:[#allocation8 + $0x340] ss:$16 sps:$4 sm:$0xff]  }
 0x13c   :  { %v265_v1 = vadd.f32 %v264_v63, %v134_v60  ;;  %v137_v60 = vsub.s32 2, %v3914_v54  ;;  %v3350_v63 = vld [vmem:[#allocation8 + $0x364] ss:$16 sps:$4 sm:$0xff]  }
 0x13d   :  { %3602 = vtanh.f32 %v263_v62  ;;  %v3930_v2 = vpop.f32.mrb[0].mxu1  ;;  %v3345_v62 = vld [vmem:[#allocation8 + $0x348] ss:$16 sps:$4 sm:$0xff]  }
 0x13e   :  { %3604 = vtanh.f32 %v265_v1  ;;  %v335_v3 = vpop.f32.mrb[1].mxu1  ;;  %v149_v1 = vsub.s32 5, %v3914_v54 }
 0x13f   :  { %v336_v4 = vadd.f32 %v335_v3, %v142_v0  ;;  %v3353_v0 = vld [vmem:[#allocation8 + $0x36c] ss:$16 sps:$4 sm:$0xff]   ;;  %v138_v3 = vrot.slane %v3917_v56, %v137_v60 }
 0x141   :  { %3606 = vtanh.f32 %v336_v4  ;;  %v3348_v4 = vld [vmem:[#allocation8 + $0x360] ss:$16 sps:$4 sm:$0xff]  }
 0x142   :  { %v3932_v5 = vpop.f32.mrb[2].mxu0 }
 0x143   :  { %v3934_v6 = vpop.f32.mrb[3].mxu0 }
 0x145   :  { %v3936_v37 = vpop.f32.mrb[2].mxu1 }
 0x146   :  { %v3938_v40 = vpop.f32.mrb[3].mxu1 }
 0x147   :  { %v3603_v7 = vpop.eup %3602 }
 0x148   :  { %v3605_v8 = vpop.eup %3604  ;;  %v488_v12 = vpack.c.bf16 %v3603_v7, %v3603_v7  ;;  %v3351_v7 = vld [vmem:[#allocation8 + $0x368] ss:$16 sps:$4 sm:$0xff]  }
 0x149   :  { %v489_v9 = vpack.c.bf16 %v3605_v8, %v3605_v8  ;;  %v3356_v8 = vld [vmem:[#allocation8 + $0x384] ss:$16 sps:$4 sm:$0xff]  }
 0x14b   :  { %v3607_v15 = vpop.eup %3606  ;;  %2086 = vmatprep.mubr.bf16.mxu0 %v489_v9  ;;  %2250 = vmatprep.mubr.bf16.mxu1 %v489_v9  ;;  %v3359_v9 = vld [vmem:[#allocation8 + $0x38c] ss:$16 sps:$4 sm:$0xff]  }
 0x14c   :  { %2087 = vmatmul.mubr.bf16.vlgmr.msra.gmra.mrb[4].mxu0 %v488_v12  ;;  %2251 = vmatmul.mubr.bf16.vlgmr.msra.gmra.mrb[4].mxu1 %v488_v12  ;;  %v491_v16 = vpack.c.bf16 %v3607_v15, %v3607_v15  ;;  %v3354_v12 = vld [vmem:[#allocation8 + $0x380] ss:$16 sps:$4 sm:$0xff]   ;;  %v3365_v15 = vld [vmem:[#allocation8 + $0x3ac] ss:$16 sps:$4 sm:$0xff]  }
 0x14d   :  { %2096 = vmatpush1.bf16.msra.mxu0 %v3282_v10  ;;  %2260 = vmatpush1.bf16.msra.mxu1 %v3285_v11  ;;  %v150_v10 = vrot.slane %v3917_v56, %v149_v1  ;;  %v334_v11 = vadd.f32 %v3930_v2, %v138_v3  ;;  %v3366_v2 = vld [vmem:[#allocation8 + $0x3c0] ss:$16 sps:$4 sm:$0xff]   ;;  %v3422_v1 = vld [vmem:[#allocation8 + $0x4e4] ss:$16 sps:$4 sm:$0xff]   ;;  %v3425_v3 = vld [vmem:[#allocation8 + $0x4ec] ss:$16 sps:$4 sm:$0xff]  }
 0x14e   :  { %2097 = vmatprep.subr.bf16.mxu0 %v3290_v13  ;;  %2261 = vmatprep.subr.bf16.mxu1 %v3293_v14  ;;  %v3357_v13 = vld [vmem:[#allocation8 + $0x388] ss:$16 sps:$4 sm:$0xff]   ;;  %v3362_v14 = vld [vmem:[#allocation8 + $0x3a4] ss:$16 sps:$4 sm:$0xff]  }
 0x14f   :  { %2127 = vmatprep.mubr.bf16.mxu0 %v491_v16  ;;  %2291 = vmatprep.mubr.bf16.mxu1 %v491_v16  ;;  %v407_v16 = vadd.f32 %v3934_v6, %v150_v10  ;;  %3608 = vtanh.f32 %v334_v11  ;;  %v3372_v6 = vld [vmem:[#allocation8 + $0x3e0] ss:$16 sps:$4 sm:$0xff]   ;;  %v3429_v11 = vld [vmem:[#allocation8 + $0x508] ss:$16 sps:$4 sm:$0xff]  }
 0x150   :  { %v3426_v10 = vld [vmem:[#allocation8 + $0x500] ss:$16 sps:$4 sm:$0xff]  }
 0x151   :  { %2098 = vmatpush1.bf16.msra.mxu0 %v3288_v17  ;;  %2262 = vmatpush1.bf16.msra.mxu1 %v3291_v18  ;;  %v3360_v17 = vld [vmem:[#allocation8 + $0x3a0] ss:$16 sps:$4 sm:$0xff]   ;;  %v3363_v18 = vld [vmem:[#allocation8 + $0x3a8] ss:$16 sps:$4 sm:$0xff]   ;;  %3610 = vtanh.f32 %v407_v16  ;;  %v3440_v16 = vld [vmem:[#allocation8 + $0x544] ss:$16 sps:$4 sm:$0xff]  }
 0x152   :  { %2099 = vmatprep.subr.bf16.mxu0 %v3296_v19  ;;  %2263 = vmatprep.subr.bf16.mxu1 %v3299_v20  ;;  %v3368_v19 = vld [vmem:[#allocation8 + $0x3c4] ss:$16 sps:$4 sm:$0xff]   ;;  %v3371_v20 = vld [vmem:[#allocation8 + $0x3cc] ss:$16 sps:$4 sm:$0xff]  }
 0x155   :  { %2100 = vmatpush1.bf16.msra.mxu0 %v3294_v21  ;;  %2264 = vmatpush1.bf16.msra.mxu1 %v3297_v22  ;;  %v3369_v21 = vld [vmem:[#allocation8 + $0x3c8] ss:$16 sps:$4 sm:$0xff]   ;;  %v3374_v22 = vld [vmem:[#allocation8 + $0x3e4] ss:$16 sps:$4 sm:$0xff]  }
 0x156   :  { %2101 = vmatprep.subr.bf16.mxu0 %v3302_v23  ;;  %2265 = vmatprep.subr.bf16.mxu1 %v3305_v24  ;;  %v3377_v23 = vld [vmem:[#allocation8 + $0x3ec] ss:$16 sps:$4 sm:$0xff]  }
 0x159   :  { %2102 = vmatpush1.bf16.msra.mxu0 %v3300_v25  ;;  %2266 = vmatpush1.bf16.msra.mxu1 %v3303_v26  ;;  %v3609_v24 = vpop.eup %3608  ;;  %v3375_v25 = vld [vmem:[#allocation8 + $0x3e8] ss:$16 sps:$4 sm:$0xff]   ;;  %v3380_v26 = vld [vmem:[#allocation8 + $0x404] ss:$16 sps:$4 sm:$0xff]  }
 0x15a   :  { %2103 = vmatprep.subr.bf16.mxu0 %v3308_v27  ;;  %2267 = vmatprep.subr.bf16.mxu1 %v3311_v28  ;;  %v3383_v27 = vld [vmem:[#allocation8 + $0x40c] ss:$16 sps:$4 sm:$0xff]  }
 0x15b   :  { %v3611_v28 = vpop.eup %3610 }
 0x15d   :  { %2104 = vmatpush1.bf16.msra.mxu0 %v3306_v29  ;;  %2268 = vmatpush1.bf16.msra.mxu1 %v3309_v30  ;;  %v490_v29 = vpack.c.bf16 %v3609_v24, %v3609_v24  ;;  %v3378_v30 = vld [vmem:[#allocation8 + $0x400] ss:$16 sps:$4 sm:$0xff]  }
 0x15e   :  { %2105 = vmatprep.subr.bf16.mxu0 %v3314_v31  ;;  %2269 = vmatprep.subr.bf16.mxu1 %v3317_v32  ;;  %v3381_v31 = vld [vmem:[#allocation8 + $0x408] ss:$16 sps:$4 sm:$0xff]   ;;  %v3386_v32 = vld [vmem:[#allocation8 + $0x424] ss:$16 sps:$4 sm:$0xff]   ;;  %v3444_v24 = vld [vmem:[#allocation8 + $0x560] ss:$16 sps:$4 sm:$0xff]  }
 0x161   :  { %2106 = vmatpush1.bf16.msra.mxu0 %v3312_v33  ;;  %2270 = vmatpush1.bf16.msra.mxu1 %v3315_v34  ;;  %v3389_v33 = vld [vmem:[#allocation8 + $0x42c] ss:$16 sps:$4 sm:$0xff]   ;;  %v493_v34 = vpack.c.bf16 %v3611_v28, %v3611_v28 }
 0x162   :  { %2107 = vmatprep.subr.bf16.mxu0 %v3320_v35  ;;  %2271 = vmatprep.subr.bf16.mxu1 %v3323_v36  ;;  %v3384_v35 = vld [vmem:[#allocation8 + $0x420] ss:$16 sps:$4 sm:$0xff]   ;;  %v3387_v36 = vld [vmem:[#allocation8 + $0x428] ss:$16 sps:$4 sm:$0xff]  }
 0x165   :  { %2108 = vmatpush1.bf16.msra.mxu0 %v3318_v38  ;;  %2272 = vmatpush1.bf16.msra.mxu1 %v3321_v39  ;;  %v3392_v38 = vld [vmem:[#allocation8 + $0x444] ss:$16 sps:$4 sm:$0xff]   ;;  %v3395_v39 = vld [vmem:[#allocation8 + $0x44c] ss:$16 sps:$4 sm:$0xff]  }
 0x166   :  { %2109 = vmatprep.subr.bf16.mxu0 %v3326_v41  ;;  %2273 = vmatprep.subr.bf16.mxu1 %v3329_v42  ;;  %v3390_v41 = vld [vmem:[#allocation8 + $0x440] ss:$16 sps:$4 sm:$0xff]   ;;  %v3393_v42 = vld [vmem:[#allocation8 + $0x448] ss:$16 sps:$4 sm:$0xff]  }
 0x169   :  { %2110 = vmatpush1.bf16.msra.mxu0 %v3324_v43  ;;  %2274 = vmatpush1.bf16.msra.mxu1 %v3327_v44  ;;  %v3398_v43 = vld [vmem:[#allocation8 + $0x464] ss:$16 sps:$4 sm:$0xff]   ;;  %v3401_v44 = vld [vmem:[#allocation8 + $0x46c] ss:$16 sps:$4 sm:$0xff]  }
 0x16a   :  { %2111 = vmatprep.subr.bf16.mxu0 %v3332_v45  ;;  %2275 = vmatprep.subr.bf16.mxu1 %v3335_v46  ;;  %v3396_v45 = vld [vmem:[#allocation8 + $0x460] ss:$16 sps:$4 sm:$0xff]   ;;  %v3399_v46 = vld [vmem:[#allocation8 + $0x468] ss:$16 sps:$4 sm:$0xff]  }
 0x16d   :  { %2112 = vmatpush1.bf16.msra.mxu0 %v3330_v47  ;;  %2276 = vmatpush1.bf16.msra.mxu1 %v3333_v48  ;;  %v3404_v47 = vld [vmem:[#allocation8 + $0x484] ss:$16 sps:$4 sm:$0xff]   ;;  %v3407_v48 = vld [vmem:[#allocation8 + $0x48c] ss:$16 sps:$4 sm:$0xff]  }
 0x16e   :  { %2113 = vmatprep.subr.bf16.mxu0 %v3338_v49  ;;  %2277 = vmatprep.subr.bf16.mxu1 %v3341_v50  ;;  %v3402_v49 = vld [vmem:[#allocation8 + $0x480] ss:$16 sps:$4 sm:$0xff]   ;;  %v3405_v50 = vld [vmem:[#allocation8 + $0x488] ss:$16 sps:$4 sm:$0xff]  }
 0x171   :  { %2114 = vmatpush1.bf16.msra.mxu0 %v3336_v51  ;;  %2278 = vmatpush1.bf16.msra.mxu1 %v3339_v52  ;;  %v3410_v51 = vld [vmem:[#allocation8 + $0x4a4] ss:$16 sps:$4 sm:$0xff]   ;;  %v3413_v52 = vld [vmem:[#allocation8 + $0x4ac] ss:$16 sps:$4 sm:$0xff]  }
 0x172   :  { %2115 = vmatprep.subr.bf16.mxu0 %v3344_v53  ;;  %2279 = vmatprep.subr.bf16.mxu1 %v3347_v58  ;;  %v3408_v53 = vld [vmem:[#allocation8 + $0x4a0] ss:$16 sps:$4 sm:$0xff]   ;;  %v3411_v58 = vld [vmem:[#allocation8 + $0x4a8] ss:$16 sps:$4 sm:$0xff]  }
 0x175   :  { %2116 = vmatpush1.bf16.msra.mxu0 %v3342_v61  ;;  %2280 = vmatpush1.bf16.msra.mxu1 %v3345_v62  ;;  %v3416_v61 = vld [vmem:[#allocation8 + $0x4c4] ss:$16 sps:$4 sm:$0xff]   ;;  %v3419_v62 = vld [vmem:[#allocation8 + $0x4cc] ss:$16 sps:$4 sm:$0xff]  }
 0x176   :  { %2117 = vmatprep.subr.bf16.mxu0 %v3350_v63  ;;  %2281 = vmatprep.subr.bf16.mxu1 %v3353_v0  ;;  %v3414_v63 = vld [vmem:[#allocation8 + $0x4c0] ss:$16 sps:$4 sm:$0xff]   ;;  %v3417_v0 = vld [vmem:[#allocation8 + $0x4c8] ss:$16 sps:$4 sm:$0xff]  }
 0x179   :  { %2118 = vmatpush1.bf16.msra.mxu0 %v3348_v4  ;;  %2282 = vmatpush1.bf16.msra.mxu1 %v3351_v7  ;;  %v3420_v4 = vld [vmem:[#allocation8 + $0x4e0] ss:$16 sps:$4 sm:$0xff]   ;;  %v3423_v7 = vld [vmem:[#allocation8 + $0x4e8] ss:$16 sps:$4 sm:$0xff]  }
 0x17a   :  { %2119 = vmatprep.subr.bf16.mxu0 %v3356_v8  ;;  %2283 = vmatprep.subr.bf16.mxu1 %v3359_v9  ;;  %v3428_v8 = vld [vmem:[#allocation8 + $0x504] ss:$16 sps:$4 sm:$0xff]   ;;  %v3431_v9 = vld [vmem:[#allocation8 + $0x50c] ss:$16 sps:$4 sm:$0xff]  }
 0x17d   :  { %2120 = vmatpush1.bf16.msra.mxu0 %v3354_v12  ;;  %2284 = vmatpush1.bf16.msra.mxu1 %v3357_v13  ;;  %v3434_v12 = vld [vmem:[#allocation8 + $0x524] ss:$16 sps:$4 sm:$0xff]   ;;  %v3437_v13 = vld [vmem:[#allocation8 + $0x52c] ss:$16 sps:$4 sm:$0xff]  }
 0x17e   :  { %2121 = vmatprep.subr.bf16.mxu0 %v3362_v14  ;;  %2285 = vmatprep.subr.bf16.mxu1 %v3365_v15  ;;  %v3432_v14 = vld [vmem:[#allocation8 + $0x520] ss:$16 sps:$4 sm:$0xff]   ;;  %v3435_v15 = vld [vmem:[#allocation8 + $0x528] ss:$16 sps:$4 sm:$0xff]  }
 0x181   :  { %2122 = vmatpush1.bf16.msra.mxu0 %v3360_v17  ;;  %2286 = vmatpush1.bf16.msra.mxu1 %v3363_v18  ;;  %v3443_v17 = vld [vmem:[#allocation8 + $0x54c] ss:$16 sps:$4 sm:$0xff]   ;;  %v145_v18 = vsub.s32 4, %v3914_v54 }
 0x182   :  { %2123 = vmatprep.subr.bf16.mxu0 %v3368_v19  ;;  %2287 = vmatprep.subr.bf16.mxu1 %v3371_v20  ;;  %v3438_v19 = vld [vmem:[#allocation8 + $0x540] ss:$16 sps:$4 sm:$0xff]   ;;  %v3441_v20 = vld [vmem:[#allocation8 + $0x548] ss:$16 sps:$4 sm:$0xff]  }
 0x185   :  { %2124 = vmatpush1.bf16.msra.mxu0 %v3366_v2  ;;  %2288 = vmatpush1.bf16.msra.mxu1 %v3369_v21  ;;  %v3446_v2 = vld [vmem:[#allocation8 + $0x564] ss:$16 sps:$4 sm:$0xff]   ;;  %v3449_v21 = vld [vmem:[#allocation8 + $0x56c] ss:$16 sps:$4 sm:$0xff]  }
 0x186   :  { %2125 = vmatprep.subr.bf16.mxu0 %v3374_v22  ;;  %2289 = vmatprep.subr.bf16.mxu1 %v3377_v23  ;;  %v157_v22 = vsub.s32 7, %v3914_v54  ;;  %v146_v23 = vrot.slane %v3917_v56, %v145_v18  ;;  %v3515_v18 = vld [vmem:[#allocation8 + $0x6cc] ss:$16 sps:$4 sm:$0xff]  }
 0x188   :  { %v405_v28 = vadd.f32 %v3932_v5, %v146_v23  ;;  %v3462_v5 = vld [vmem:[#allocation8 + $0x5c0] ss:$16 sps:$4 sm:$0xff]   ;;  %v3519_v23 = vld [vmem:[#allocation8 + $0x6e8] ss:$16 sps:$4 sm:$0xff]  }
 0x189   :  { %2126 = vmatpush1.bf16.msra.mxu0 %v3372_v6  ;;  %2290 = vmatpush1.bf16.msra.mxu1 %v3375_v25  ;;  %v3447_v6 = vld [vmem:[#allocation8 + $0x568] ss:$16 sps:$4 sm:$0xff]   ;;  %v3452_v25 = vld [vmem:[#allocation8 + $0x584] ss:$16 sps:$4 sm:$0xff]  }
 0x18a   :  { %2136 = vmatprep.subr.bf16.mxu0 %v3380_v26  ;;  %2300 = vmatprep.subr.bf16.mxu1 %v3383_v27  ;;  %v3455_v26 = vld [vmem:[#allocation8 + $0x58c] ss:$16 sps:$4 sm:$0xff]   ;;  %v158_v27 = vrot.slane %v3917_v56, %v157_v22  ;;  %3612 = vtanh.f32 %v405_v28  ;;  %v3516_v22 = vld [vmem:[#allocation8 + $0x6e0] ss:$16 sps:$4 sm:$0xff]  }
 0x18b   :  { %v3533_v28 = vld [vmem:[#allocation8 + $0x72c] ss:$16 sps:$4 sm:$0xff]  }
 0x18c   :  { %2128 = vmatmul.mubr.bf16.vlgmr.msra.gmra.mrb[4].mxu0 %v490_v29  ;;  %2292 = vmatmul.mubr.bf16.vlgmr.msra.gmra.mrb[4].mxu1 %v490_v29  ;;  %v3450_v29 = vld [vmem:[#allocation8 + $0x580] ss:$16 sps:$4 sm:$0xff]  }
 0x18d   :  { %2137 = vmatpush1.bf16.msra.mxu0 %v3378_v30  ;;  %2301 = vmatpush1.bf16.msra.mxu1 %v3381_v31  ;;  %v3453_v30 = vld [vmem:[#allocation8 + $0x588] ss:$16 sps:$4 sm:$0xff]   ;;  %v3458_v31 = vld [vmem:[#allocation8 + $0x5a4] ss:$16 sps:$4 sm:$0xff]  }
 0x18e   :  { %2138 = vmatprep.subr.bf16.mxu0 %v3386_v32  ;;  %2302 = vmatprep.subr.bf16.mxu1 %v3389_v33  ;;  %v3461_v32 = vld [vmem:[#allocation8 + $0x5ac] ss:$16 sps:$4 sm:$0xff]   ;;  %v478_v33 = vadd.f32 %v3938_v40, %v158_v27  ;;  %v3468_v40 = vld [vmem:[#allocation8 + $0x5e0] ss:$16 sps:$4 sm:$0xff]   ;;  %v3530_v27 = vld [vmem:[#allocation8 + $0x724] ss:$16 sps:$4 sm:$0xff]  }
 0x18f   :  { %2168 = vmatprep.mubr.bf16.mxu0 %v493_v34  ;;  %2332 = vmatprep.mubr.bf16.mxu1 %v493_v34  ;;  %v3456_v34 = vld [vmem:[#allocation8 + $0x5a0] ss:$16 sps:$4 sm:$0xff]  }
 0x190   :  { %3614 = vtanh.f32 %v478_v33  ;;  %v153_v33 = vsub.s32 6, %v3914_v54 }
 0x191   :  { %2139 = vmatpush1.bf16.msra.mxu0 %v3384_v35  ;;  %2303 = vmatpush1.bf16.msra.mxu1 %v3387_v36  ;;  %v3459_v35 = vld [vmem:[#allocation8 + $0x5a8] ss:$16 sps:$4 sm:$0xff]   ;;  %v3464_v36 = vld [vmem:[#allocation8 + $0x5c4] ss:$16 sps:$4 sm:$0xff]  }
 0x192   :  { %2140 = vmatprep.subr.bf16.mxu0 %v3392_v38  ;;  %2304 = vmatprep.subr.bf16.mxu1 %v3395_v39  ;;  %v3467_v38 = vld [vmem:[#allocation8 + $0x5cc] ss:$16 sps:$4 sm:$0xff]   ;;  %v3465_v39 = vld [vmem:[#allocation8 + $0x5c8] ss:$16 sps:$4 sm:$0xff]  }
 0x195   :  { %2141 = vmatpush1.bf16.msra.mxu0 %v3390_v41  ;;  %2305 = vmatpush1.bf16.msra.mxu1 %v3393_v42  ;;  %v3470_v41 = vld [vmem:[#allocation8 + $0x5e4] ss:$16 sps:$4 sm:$0xff]   ;;  %v3473_v42 = vld [vmem:[#allocation8 + $0x5ec] ss:$16 sps:$4 sm:$0xff]  }
 0x196   :  { %2142 = vmatprep.subr.bf16.mxu0 %v3398_v43  ;;  %2306 = vmatprep.subr.bf16.mxu1 %v3401_v44  ;;  %v3613_v43 = vpop.eup %3612  ;;  %v3471_v44 = vld [vmem:[#allocation8 + $0x5e8] ss:$16 sps:$4 sm:$0xff]  }
 0x199   :  { %2143 = vmatpush1.bf16.msra.mxu0 %v3396_v45  ;;  %2307 = vmatpush1.bf16.msra.mxu1 %v3399_v46  ;;  %v3476_v45 = vld [vmem:[#allocation8 + $0x604] ss:$16 sps:$4 sm:$0xff]   ;;  %v3479_v46 = vld [vmem:[#allocation8 + $0x60c] ss:$16 sps:$4 sm:$0xff]  }
 0x19a   :  { %2144 = vmatprep.subr.bf16.mxu0 %v3404_v47  ;;  %2308 = vmatprep.subr.bf16.mxu1 %v3407_v48  ;;  %v3615_v47 = vpop.eup %3614  ;;  %v492_v48 = vpack.c.bf16 %v3613_v43, %v3613_v43  ;;  %v3551_v43 = vld [vmem:[#allocation8 + $0x78c] ss:$16 sps:$4 sm:$0xff]  }
 0x19d   :  { %2145 = vmatpush1.bf16.msra.mxu0 %v3402_v49  ;;  %2309 = vmatpush1.bf16.msra.mxu1 %v3405_v50  ;;  %v3474_v49 = vld [vmem:[#allocation8 + $0x600] ss:$16 sps:$4 sm:$0xff]   ;;  %v3477_v50 = vld [vmem:[#allocation8 + $0x608] ss:$16 sps:$4 sm:$0xff]  }
 0x19e   :  { %2146 = vmatprep.subr.bf16.mxu0 %v3410_v51  ;;  %2310 = vmatprep.subr.bf16.mxu1 %v3413_v52  ;;  %v3482_v51 = vld [vmem:[#allocation8 + $0x624] ss:$16 sps:$4 sm:$0xff]   ;;  %v3485_v52 = vld [vmem:[#allocation8 + $0x62c] ss:$16 sps:$4 sm:$0xff]  }
 0x1a1   :  { %2147 = vmatpush1.bf16.msra.mxu0 %v3408_v53  ;;  %2311 = vmatpush1.bf16.msra.mxu1 %v3411_v58  ;;  %v495_v53 = vpack.c.bf16 %v3615_v47, %v3615_v47  ;;  %v3480_v58 = vld [vmem:[#allocation8 + $0x620] ss:$16 sps:$4 sm:$0xff]   ;;  %v3557_v47 = vld [vmem:[#allocation8 + $0x7ac] ss:$16 sps:$4 sm:$0xff]  }
 0x1a2   :  { %2148 = vmatprep.subr.bf16.mxu0 %v3416_v61  ;;  %2312 = vmatprep.subr.bf16.mxu1 %v3419_v62  ;;  %v3483_v61 = vld [vmem:[#allocation8 + $0x628] ss:$16 sps:$4 sm:$0xff]   ;;  %v3488_v62 = vld [vmem:[#allocation8 + $0x644] ss:$16 sps:$4 sm:$0xff]  }
 0x1a5   :  { %2149 = vmatpush1.bf16.msra.mxu0 %v3414_v63  ;;  %2313 = vmatpush1.bf16.msra.mxu1 %v3417_v0  ;;  %v3491_v63 = vld [vmem:[#allocation8 + $0x64c] ss:$16 sps:$4 sm:$0xff]   ;;  %v3486_v0 = vld [vmem:[#allocation8 + $0x640] ss:$16 sps:$4 sm:$0xff]  }
 0x1a6   :  { %2150 = vmatprep.subr.bf16.mxu0 %v3422_v1  ;;  %2314 = vmatprep.subr.bf16.mxu1 %v3425_v3  ;;  %v3489_v1 = vld [vmem:[#allocation8 + $0x648] ss:$16 sps:$4 sm:$0xff]   ;;  %v3494_v3 = vld [vmem:[#allocation8 + $0x664] ss:$16 sps:$4 sm:$0xff]  }
 0x1a9   :  { %2151 = vmatpush1.bf16.msra.mxu0 %v3420_v4  ;;  %2315 = vmatpush1.bf16.msra.mxu1 %v3423_v7  ;;  %v3497_v4 = vld [vmem:[#allocation8 + $0x66c] ss:$16 sps:$4 sm:$0xff]   ;;  %v3492_v7 = vld [vmem:[#allocation8 + $0x660] ss:$16 sps:$4 sm:$0xff]  }
 0x1aa   :  { %2152 = vmatprep.subr.bf16.mxu0 %v3428_v8  ;;  %2316 = vmatprep.subr.bf16.mxu1 %v3431_v9  ;;  %v3495_v8 = vld [vmem:[#allocation8 + $0x668] ss:$16 sps:$4 sm:$0xff]   ;;  %v3500_v9 = vld [vmem:[#allocation8 + $0x684] ss:$16 sps:$4 sm:$0xff]  }
 0x1ad   :  { %2153 = vmatpush1.bf16.msra.mxu0 %v3426_v10  ;;  %2317 = vmatpush1.bf16.msra.mxu1 %v3429_v11  ;;  %v3503_v10 = vld [vmem:[#allocation8 + $0x68c] ss:$16 sps:$4 sm:$0xff]   ;;  %v3498_v11 = vld [vmem:[#allocation8 + $0x680] ss:$16 sps:$4 sm:$0xff]  }
 0x1ae   :  { %2154 = vmatprep.subr.bf16.mxu0 %v3434_v12  ;;  %2318 = vmatprep.subr.bf16.mxu1 %v3437_v13  ;;  %v3501_v12 = vld [vmem:[#allocation8 + $0x688] ss:$16 sps:$4 sm:$0xff]   ;;  %v3506_v13 = vld [vmem:[#allocation8 + $0x6a4] ss:$16 sps:$4 sm:$0xff]  }
 0x1b1   :  { %2155 = vmatpush1.bf16.msra.mxu0 %v3432_v14  ;;  %2319 = vmatpush1.bf16.msra.mxu1 %v3435_v15  ;;  %v3509_v14 = vld [vmem:[#allocation8 + $0x6ac] ss:$16 sps:$4 sm:$0xff]   ;;  %v3504_v15 = vld [vmem:[#allocation8 + $0x6a0] ss:$16 sps:$4 sm:$0xff]  }
 0x1b2   :  { %2156 = vmatprep.subr.bf16.mxu0 %v3440_v16  ;;  %2320 = vmatprep.subr.bf16.mxu1 %v3443_v17  ;;  %v3507_v16 = vld [vmem:[#allocation8 + $0x6a8] ss:$16 sps:$4 sm:$0xff]   ;;  %v3512_v17 = vld [vmem:[#allocation8 + $0x6c4] ss:$16 sps:$4 sm:$0xff]  }
 0x1b5   :  { %2157 = vmatpush1.bf16.msra.mxu0 %v3438_v19  ;;  %2321 = vmatpush1.bf16.msra.mxu1 %v3441_v20  ;;  %v3510_v19 = vld [vmem:[#allocation8 + $0x6c0] ss:$16 sps:$4 sm:$0xff]   ;;  %v3513_v20 = vld [vmem:[#allocation8 + $0x6c8] ss:$16 sps:$4 sm:$0xff]  }
 0x1b6   :  { %2158 = vmatprep.subr.bf16.mxu0 %v3446_v2  ;;  %2322 = vmatprep.subr.bf16.mxu1 %v3449_v21  ;;  %v3518_v2 = vld [vmem:[#allocation8 + $0x6e4] ss:$16 sps:$4 sm:$0xff]   ;;  %v3521_v21 = vld [vmem:[#allocation8 + $0x6ec] ss:$16 sps:$4 sm:$0xff]  }
 0x1b9   :  { %2159 = vmatpush1.bf16.msra.mxu0 %v3444_v24  ;;  %2323 = vmatpush1.bf16.msra.mxu1 %v3447_v6  ;;  %v3524_v24 = vld [vmem:[#allocation8 + $0x704] ss:$16 sps:$4 sm:$0xff]   ;;  %v3527_v6 = vld [vmem:[#allocation8 + $0x70c] ss:$16 sps:$4 sm:$0xff]  }
 0x1ba   :  { %2160 = vmatprep.subr.bf16.mxu0 %v3452_v25  ;;  %2324 = vmatprep.subr.bf16.mxu1 %v3455_v26  ;;  %v3522_v25 = vld [vmem:[#allocation8 + $0x700] ss:$16 sps:$4 sm:$0xff]   ;;  %v3525_v26 = vld [vmem:[#allocation8 + $0x708] ss:$16 sps:$4 sm:$0xff]  }
 0x1bd   :  { %2161 = vmatpush1.bf16.msra.mxu0 %v3450_v29  ;;  %2325 = vmatpush1.bf16.msra.mxu1 %v3453_v30  ;;  %v3528_v29 = vld [vmem:[#allocation8 + $0x720] ss:$16 sps:$4 sm:$0xff]   ;;  %v3531_v30 = vld [vmem:[#allocation8 + $0x728] ss:$16 sps:$4 sm:$0xff]  }
 0x1be   :  { %2162 = vmatprep.subr.bf16.mxu0 %v3458_v31  ;;  %2326 = vmatprep.subr.bf16.mxu1 %v3461_v32  ;;  %v3536_v31 = vld [vmem:[#allocation8 + $0x744] ss:$16 sps:$4 sm:$0xff]   ;;  %v3539_v32 = vld [vmem:[#allocation8 + $0x74c] ss:$16 sps:$4 sm:$0xff]  }
 0x1c1   :  { %2163 = vmatpush1.bf16.msra.mxu0 %v3456_v34  ;;  %2327 = vmatpush1.bf16.msra.mxu1 %v3459_v35  ;;  %v3534_v34 = vld [vmem:[#allocation8 + $0x740] ss:$16 sps:$4 sm:$0xff]   ;;  %v3537_v35 = vld [vmem:[#allocation8 + $0x748] ss:$16 sps:$4 sm:$0xff]  }
 0x1c2   :  { %2164 = vmatprep.subr.bf16.mxu0 %v3464_v36  ;;  %2328 = vmatprep.subr.bf16.mxu1 %v3467_v38  ;;  %v3542_v36 = vld [vmem:[#allocation8 + $0x764] ss:$16 sps:$4 sm:$0xff]   ;;  %v3545_v38 = vld [vmem:[#allocation8 + $0x76c] ss:$16 sps:$4 sm:$0xff]  }
 0x1c5   :  { %2165 = vmatpush1.bf16.msra.mxu0 %v3462_v5  ;;  %2329 = vmatpush1.bf16.msra.mxu1 %v3465_v39  ;;  %v154_v5 = vrot.slane %v3917_v56, %v153_v33  ;;  %v3540_v39 = vld [vmem:[#allocation8 + $0x760] ss:$16 sps:$4 sm:$0xff]  }
 0x1c6   :  { %2166 = vmatprep.subr.bf16.mxu0 %v3470_v41  ;;  %2330 = vmatprep.subr.bf16.mxu1 %v3473_v42  ;;  %v3543_v41 = vld [vmem:[#allocation8 + $0x768] ss:$16 sps:$4 sm:$0xff]   ;;  %v3548_v42 = vld [vmem:[#allocation8 + $0x784] ss:$16 sps:$4 sm:$0xff]   ;;  %v3552_v56 = vld [vmem:[#allocation8 + $0x7a0] ss:$16 sps:$4 sm:$0xff]  }
 0x1c7   :  { %v752_v33 = vld [vmem:[%s3987_s4] sm:$0xf] }
 0x1c9   :  { %2167 = vmatpush1.bf16.msra.mxu0 %v3468_v40  ;;  %2331 = vmatpush1.bf16.msra.mxu1 %v3471_v44  ;;  %v476_v40 = vadd.f32 %v3936_v37, %v154_v5  ;;  %v3546_v44 = vld [vmem:[#allocation8 + $0x780] ss:$16 sps:$4 sm:$0xff]  }
 0x1ca   :  { %2177 = vmatprep.subr.bf16.mxu0 %v3476_v45  ;;  %2341 = vmatprep.subr.bf16.mxu1 %v3479_v46  ;;  %v3549_v45 = vld [vmem:[#allocation8 + $0x788] ss:$16 sps:$4 sm:$0xff]   ;;  %v3554_v46 = vld [vmem:[#allocation8 + $0x7a4] ss:$16 sps:$4 sm:$0xff]   ;;  %v3558_v37 = vld [vmem:[#allocation8 + $0x7c0] ss:$16 sps:$4 sm:$0xff]  }
 0x1cb   :  { %3616 = vtanh.f32 %v476_v40 }
 0x1cc   :  { %2169 = vmatmul.mubr.bf16.vlgmr.msra.gmra.mrb[4].mxu0 %v492_v48  ;;  %2333 = vmatmul.mubr.bf16.vlgmr.msra.gmra.mrb[4].mxu1 %v492_v48  ;;  %v3555_v48 = vld [vmem:[#allocation8 + $0x7a8] ss:$16 sps:$4 sm:$0xff]  }
 0x1cd   :  { %2178 = vmatpush1.bf16.msra.mxu0 %v3474_v49  ;;  %2342 = vmatpush1.bf16.msra.mxu1 %v3477_v50  ;;  %v3560_v49 = vld [vmem:[#allocation8 + $0x7c4] ss:$16 sps:$4 sm:$0xff]   ;;  %v3563_v50 = vld [vmem:[#allocation8 + $0x7cc] ss:$16 sps:$4 sm:$0xff]  }
 0x1ce   :  { %2179 = vmatprep.subr.bf16.mxu0 %v3482_v51  ;;  %2343 = vmatprep.subr.bf16.mxu1 %v3485_v52  ;;  %v3561_v51 = vld [vmem:[#allocation8 + $0x7c8] ss:$16 sps:$4 sm:$0xff]   ;;  %v3566_v52 = vld [vmem:[#allocation8 + $0x7e4] ss:$16 sps:$4 sm:$0xff]  }
 0x1cf   :  { %2209 = vmatprep.mubr.bf16.mxu0 %v495_v53  ;;  %2373 = vmatprep.mubr.bf16.mxu1 %v495_v53  ;;  %v3569_v53 = vld [vmem:[#allocation8 + $0x7ec] ss:$16 sps:$4 sm:$0xff]  }
 0x1d1   :  { %2180 = vmatpush1.bf16.msra.mxu0 %v3480_v58  ;;  %2344 = vmatpush1.bf16.msra.mxu1 %v3483_v61  ;;  %v3564_v58 = vld [vmem:[#allocation8 + $0x7e0] ss:$16 sps:$4 sm:$0xff]   ;;  %v3567_v61 = vld [vmem:[#allocation8 + $0x7e8] ss:$16 sps:$4 sm:$0xff]  }
 0x1d2   :  { %2181 = vmatprep.subr.bf16.mxu0 %v3488_v62  ;;  %2345 = vmatprep.subr.bf16.mxu1 %v3491_v63  ;;  %v3570_v62 = vld [vmem:[#allocation10 + $0x40] sm:$0xff]  }
 0x1d3   :  { %v3571_v63 = vld [vmem:[#allocation10 + $0xc0] sm:$0xff]  }
 0x1d5   :  { %2182 = vmatpush1.bf16.msra.mxu0 %v3486_v0  ;;  %2346 = vmatpush1.bf16.msra.mxu1 %v3489_v1  ;;  %v3617_v0 = vpop.eup %3616  ;;  %v3572_v1 = vld [vmem:[#allocation10] sm:$0xff]  }
 0x1d6   :  { %2183 = vmatprep.subr.bf16.mxu0 %v3494_v3  ;;  %2347 = vmatprep.subr.bf16.mxu1 %v3497_v4  ;;  %v3573_v3 = vld [vmem:[#allocation10 + $0x80] sm:$0xff]   ;;  %v494_v4 = vpack.c.bf16 %v3617_v0, %v3617_v0 }
 0x1d9   :  { %2184 = vmatpush1.bf16.msra.mxu0 %v3492_v7  ;;  %2348 = vmatpush1.bf16.msra.mxu1 %v3495_v8  ;;  %v3574_v7 = vld [vmem:[#allocation10 + $0x48] sm:$0xff]  }
 0x1da   :  { %2185 = vmatprep.subr.bf16.mxu0 %v3500_v9  ;;  %2349 = vmatprep.subr.bf16.mxu1 %v3503_v10  ;;  %v3575_v8 = vld [vmem:[#allocation10 + $0xc8] sm:$0xff]  }
 0x1db   :  { %v3576_v9 = vld [vmem:[#allocation10 + $0x8] sm:$0xff]  }
 0x1dc   :  { %v3577_v10 = vld [vmem:[#allocation10 + $0x88] sm:$0xff]  }
 0x1dd   :  { %2186 = vmatpush1.bf16.msra.mxu0 %v3498_v11  ;;  %2350 = vmatpush1.bf16.msra.mxu1 %v3501_v12  ;;  %v3578_v11 = vld [vmem:[#allocation10 + $0x50] sm:$0xff]  }
 0x1de   :  { %2187 = vmatprep.subr.bf16.mxu0 %v3506_v13  ;;  %2351 = vmatprep.subr.bf16.mxu1 %v3509_v14  ;;  %v3579_v12 = vld [vmem:[#allocation10 + $0xd0] sm:$0xff]  }
 0x1df   :  { %v3580_v13 = vld [vmem:[#allocation10 + $0x10] sm:$0xff]  }
 0x1e0   :  { %v3581_v14 = vld [vmem:[#allocation10 + $0x90] sm:$0xff]  }
 0x1e1   :  { %2188 = vmatpush1.bf16.msra.mxu0 %v3504_v15  ;;  %2352 = vmatpush1.bf16.msra.mxu1 %v3507_v16  ;;  %v3582_v15 = vld [vmem:[#allocation10 + $0x58] sm:$0xff]  }
 0x1e2   :  { %2189 = vmatprep.subr.bf16.mxu0 %v3512_v17  ;;  %2353 = vmatprep.subr.bf16.mxu1 %v3515_v18  ;;  %v3583_v16 = vld [vmem:[#allocation10 + $0xd8] sm:$0xff]  }
 0x1e3   :  { %v3584_v17 = vld [vmem:[#allocation10 + $0x18] sm:$0xff]  }
 0x1e4   :  { %v3585_v18 = vld [vmem:[#allocation10 + $0x98] sm:$0xff]  }
 0x1e5   :  { %2190 = vmatpush1.bf16.msra.mxu0 %v3510_v19  ;;  %2354 = vmatpush1.bf16.msra.mxu1 %v3513_v20  ;;  %v3586_v19 = vld [vmem:[#allocation10 + $0x60] sm:$0xff]  }
 0x1e6   :  { %2191 = vmatprep.subr.bf16.mxu0 %v3518_v2  ;;  %2355 = vmatprep.subr.bf16.mxu1 %v3521_v21  ;;  %v3587_v20 = vld [vmem:[#allocation10 + $0xe0] sm:$0xff]  }
 0x1e7   :  { %v3588_v2 = vld [vmem:[#allocation10 + $0x20] sm:$0xff]  }
 0x1e8   :  { %v3589_v21 = vld [vmem:[#allocation10 + $0xa0] sm:$0xff]  }
 0x1e9   :  { %2192 = vmatpush1.bf16.msra.mxu0 %v3516_v22  ;;  %2356 = vmatpush1.bf16.msra.mxu1 %v3519_v23  ;;  %v3590_v22 = vld [vmem:[#allocation10 + $0x68] sm:$0xff]  }
 0x1ea   :  { %2193 = vmatprep.subr.bf16.mxu0 %v3524_v24  ;;  %2357 = vmatprep.subr.bf16.mxu1 %v3527_v6  ;;  %v3591_v23 = vld [vmem:[#allocation10 + $0xe8] sm:$0xff]  }
 0x1eb   :  { %v3592_v24 = vld [vmem:[#allocation10 + $0x28] sm:$0xff]  }
 0x1ec   :  { %v3593_v6 = vld [vmem:[#allocation10 + $0xa8] sm:$0xff]  }
 0x1ed   :  { %2194 = vmatpush1.bf16.msra.mxu0 %v3522_v25  ;;  %2358 = vmatpush1.bf16.msra.mxu1 %v3525_v26  ;;  %v3594_v25 = vld [vmem:[#allocation10 + $0x70] sm:$0xff]  }
 0x1ee   :  { %2195 = vmatprep.subr.bf16.mxu0 %v3530_v27  ;;  %2359 = vmatprep.subr.bf16.mxu1 %v3533_v28  ;;  %v3595_v26 = vld [vmem:[#allocation10 + $0xf0] sm:$0xff]  }
 0x1ef   :  { %v3596_v27 = vld [vmem:[#allocation10 + $0x30] sm:$0xff]  }
 0x1f0   :  { %v3597_v28 = vld [vmem:[#allocation10 + $0xb0] sm:$0xff]  }
 0x1f1   :  { %2196 = vmatpush1.bf16.msra.mxu0 %v3528_v29  ;;  %2360 = vmatpush1.bf16.msra.mxu1 %v3531_v30  ;;  %v3598_v29 = vld [vmem:[#allocation10 + $0x78] sm:$0xff]  }
 0x1f2   :  { %2197 = vmatprep.subr.bf16.mxu0 %v3536_v31  ;;  %2361 = vmatprep.subr.bf16.mxu1 %v3539_v32  ;;  %v3599_v30 = vld [vmem:[#allocation10 + $0xf8] sm:$0xff]  }
 0x1f3   :  { %v3600_v31 = vld [vmem:[#allocation10 + $0x38] sm:$0xff]  }
 0x1f4   :  { %v3601_v32 = vld [vmem:[#allocation10 + $0xb8] sm:$0xff]  }
 0x1f5   :  { %2198 = vmatpush1.bf16.msra.mxu0 %v3534_v34  ;;  %2362 = vmatpush1.bf16.msra.mxu1 %v3537_v35  ;;  %v757_v34 = vrot.slane %v752_v33, %v129_v55  ;;  %v765_v35 = vrot.slane %v752_v33, %v137_v60 }
 0x1f6   :  { %2199 = vmatprep.subr.bf16.mxu0 %v3542_v36  ;;  %2363 = vmatprep.subr.bf16.mxu1 %v3545_v38  ;;  %v761_v36 = vrot.slane %v752_v33, %v133_v57  ;;  %v769_v38 = vrot.slane %v752_v33, %v141_v59 }
 0x1f9   :  { %2200 = vmatpush1.bf16.msra.mxu0 %v3540_v39  ;;  %2364 = vmatpush1.bf16.msra.mxu1 %v3543_v41 }
 0x1fa   :  { %2201 = vmatprep.subr.bf16.mxu0 %v3548_v42  ;;  %2365 = vmatprep.subr.bf16.mxu1 %v3551_v43 }
 0x1fd   :  { %2202 = vmatpush1.bf16.msra.mxu0 %v3546_v44  ;;  %2366 = vmatpush1.bf16.msra.mxu1 %v3549_v45 }
 0x1fe   :  { %2203 = vmatprep.subr.bf16.mxu0 %v3554_v46  ;;  %2367 = vmatprep.subr.bf16.mxu1 %v3557_v47 }
 0x201   :  { %2204 = vmatpush1.bf16.msra.mxu0 %v3552_v56  ;;  %2368 = vmatpush1.bf16.msra.mxu1 %v3555_v48 }
 0x202   :  { %2205 = vmatprep.subr.bf16.mxu0 %v3560_v49  ;;  %2369 = vmatprep.subr.bf16.mxu1 %v3563_v50 }
 0x205   :  { %2206 = vmatpush1.bf16.msra.mxu0 %v3558_v37  ;;  %2370 = vmatpush1.bf16.msra.mxu1 %v3561_v51 }
 0x206   :  { %2207 = vmatprep.subr.bf16.mxu0 %v3566_v52  ;;  %2371 = vmatprep.subr.bf16.mxu1 %v3569_v53  ;;  %v3028_v53 = vld [vmem:[%s3989_s6] ss:$0 sm:$0xff]  ;;  %s3782_s6 = smov [#allocation11]  }
 0x207   :  { %s2749_s16 = sshll.u32 %s3782_s6, 4  ;;  %s2750_s16 = int_to_ptr.vmem [resolvable:$true] %s2749_s16 }
 0x208   :  { %s3740_s18 = scalar_lea.vmem %s2750_s16, 128  ;;  %p3745_p13 = scmp.lt.s32.totalorder %s2750_s16, %s2750_s16 }
 0x209   :  { %2208 = vmatpush1.bf16.msra.mxu0 %v3564_v58  ;;  %2372 = vmatpush1.bf16.msra.mxu1 %v3567_v61  ;;  %p3741_p12 = scmp.ne.s32.totalorder %s2750_s16, %s3740_s18  ;;  %p3746_p0 = scmp.lt.s32.totalorder %s3740_s18, %s3740_s18 }
 0x20a   :  { %3061 = vmatprep.subr.bf16.mxu0 %v3570_v62  ;;  %3083 = vmatprep.subr.bf16.mxu1 %v3571_v63 }
 0x20b   :  { %p3747_p1 = por %p3746_p0, %p3745_p13 }
 0x20c   :  { %2210 = vmatmul.mubr.bf16.vlgmr.msra.gmra.mrb[4].mxu0 %v494_v4  ;;  %2374 = vmatmul.mubr.bf16.vlgmr.msra.gmra.mrb[4].mxu1 %v494_v4 }
 0x20d   :  { %3062 = vmatpush3.bf16.msra.mxu0 %v3572_v1  ;;  %3084 = vmatpush3.bf16.msra.mxu1 %v3573_v3  ;;  %p3748_p2 = pnand %p3747_p1, %p3741_p12 }
 0x20e   :  { %3063 = vmatprep.subr.bf16.mxu0 %v3574_v7  ;;  %3085 = vmatprep.subr.bf16.mxu1 %v3575_v8 }
 0x211   :  { %3064 = vmatpush3.bf16.msra.mxu0 %v3576_v9  ;;  %3086 = vmatpush3.bf16.msra.mxu1 %v3577_v10 }
 0x212   :  { %3065 = vmatprep.subr.bf16.mxu0 %v3578_v11  ;;  %3087 = vmatprep.subr.bf16.mxu1 %v3579_v12 }
 0x215   :  { %3066 = vmatpush3.bf16.msra.mxu0 %v3580_v13  ;;  %3088 = vmatpush3.bf16.msra.mxu1 %v3581_v14 }
 0x216   :  { %3067 = vmatprep.subr.bf16.mxu0 %v3582_v15  ;;  %3089 = vmatprep.subr.bf16.mxu1 %v3583_v16 }
 0x219   :  { %3068 = vmatpush3.bf16.msra.mxu0 %v3584_v17  ;;  %3090 = vmatpush3.bf16.msra.mxu1 %v3585_v18 }
 0x21a   :  { %3069 = vmatprep.subr.bf16.mxu0 %v3586_v19  ;;  %3091 = vmatprep.subr.bf16.mxu1 %v3587_v20 }
 0x21d   :  { %3070 = vmatpush3.bf16.msra.mxu0 %v3588_v2  ;;  %3092 = vmatpush3.bf16.msra.mxu1 %v3589_v21 }
 0x21e   :  { %3071 = vmatprep.subr.bf16.mxu0 %v3590_v22  ;;  %3093 = vmatprep.subr.bf16.mxu1 %v3591_v23 }
 0x221   :  { %3072 = vmatpush3.bf16.msra.mxu0 %v3592_v24  ;;  %3094 = vmatpush3.bf16.msra.mxu1 %v3593_v6 }
 0x222   :  { %3073 = vmatprep.subr.bf16.mxu0 %v3594_v25  ;;  %3095 = vmatprep.subr.bf16.mxu1 %v3595_v26 }
 0x225   :  { %3074 = vmatpush3.bf16.msra.mxu0 %v3596_v27  ;;  %3096 = vmatpush3.bf16.msra.mxu1 %v3597_v28 }
 0x226   :  { %3075 = vmatprep.subr.bf16.mxu0 %v3598_v29  ;;  %3097 = vmatprep.subr.bf16.mxu1 %v3599_v30 }
 0x229   :  { %3076 = vmatpush3.bf16.msra.mxu0 %v3600_v31  ;;  %3098 = vmatpush3.bf16.msra.mxu1 %v3601_v32 }
 0x2df   :  { %v2211_v5 = vpop.f32.mrb[4].mxu0  ;;  %v2375_v39 = vpop.f32.mrb[4].mxu1 }
 0x2e0   :  { %v3145_v41 = vadd.f32 %v2211_v5, %v757_v34  ;;  %v3147_v42 = vadd.f32 %v2375_v39, %v765_v35  ;;  %v2213_v43 = vpop.f32.mrb[5].mxu0  ;;  %v2377_v40 = vpop.f32.mrb[5].mxu1 }
 0x2e1   :  { %v3146_v44 = vadd.f32 %v2213_v43, %v761_v36  ;;  %v3148_v45 = vadd.f32 %v2377_v40, %v769_v38  ;;  %v2215_v46 = vpop.f32.mrb[6].mxu0  ;;  %v2379_v47 = vpop.f32.mrb[6].mxu1 }
 0x2e2   :  { %3618 = vtanh.f32 %v3145_v41  ;;  %v2216_v55 = vpop.f32.mrb[7].mxu0  ;;  %v2380_v56 = vpop.f32.mrb[7].mxu1 }
 0x2e3   :  { %3620 = vtanh.f32 %v3147_v42 }
 0x2e4   :  { %3622 = vtanh.f32 %v3146_v44 }
 0x2e5   :  { %3624 = vtanh.f32 %v3148_v45 }
 0x2ec   :  { %v3619_v57 = vpop.eup %3618 }
 0x2ed   :  { %v3621_v60 = vpop.eup %3620  ;;  %v2386_v49 = vpack.c.bf16 %v3619_v57, %v3619_v57 }
 0x2ee   :  { %v3623_v54 = vpop.eup %3622  ;;  %v2388_v37 = vpack.c.bf16 %v3621_v60, %v3621_v60 }
 0x2ef   :  { %v3625_v59 = vpop.eup %3624  ;;  %v2387_v48 = vpack.c.bf16 %v3623_v54, %v3623_v54 }
 0x2f0   :  { %v2389_v50 = vpack.c.bf16 %v3625_v59, %v3625_v59 }
 0x2f1   :  { %2685 = vmatprep.mubr.bf16.mxu0 %v2387_v48 }
 0x2f2   :  { %2725 = vmatprep.mubr.bf16.mxu1 %v2389_v50  ;;  %2686 = vmatmul.mubr.bf16.vlgmr.msra.gmra.mrb[8].mxu0 %v2386_v49 }
 0x2f3   :  { %2726 = vmatmul.mubr.bf16.vlgmr.msra.gmra.mrb[8].mxu1 %v2388_v37 }
 0x3c5   :  { %v3077_v51 = vpop.f32.mrb[8].mxu0 }
 0x3c6   :  { %v3099_v52 = vpop.f32.mrb[8].mxu1  ;;  %v3078_v58 = vpop.f32.mrb[9].mxu0 }
 0x3c7   :  { %v3079_v61 = vadd.f32 %v3078_v58, %v3077_v51  ;;  %v3100_v62 = vpop.f32.mrb[9].mxu1  ;;  %v3080_v63 = vpop.f32.mrb[10].mxu0 }
 0x3c8   :  { %v3101_v0 = vadd.f32 %v3100_v62, %v3099_v52  ;;  %v3102_v1 = vpop.f32.mrb[10].mxu1  ;;  %v3081_v3 = vpop.f32.mrb[11].mxu0 }
 0x3c9   :  { %v2688_v4 = vadd.f32 %v3079_v61, %v3028_v53  ;;  %v3103_v7 = vpop.f32.mrb[11].mxu1 }
 0x3cb   :  { %v2728_v8 = vadd.f32 %v3101_v0, %v2688_v4 }
 0x3cd   :  { %2733 = vmax.xlane.f32.xlu0 %v2728_v8 }
 0x45a   :  { %v2734_v9 = vpop.xlane.xlu0 %2733 }
 0x45b   :  { %v2735_v10 = vsub.f32 %v2728_v8, %v2734_v9 }
 0x45d   :  { %v2736_v11 = vmul.f32 1.442695, %v2735_v10 }
 0x45f   :  { %3626 = vpow2.f32 %v2736_v11 }
 0x469   :  { %v3627_v12 = vpop.eup %3626 }
 0x46a   :  { %2738 = vadd.xlane.f32.xlu0 %v3627_v12 }
 0x4f7   :  { %v2739_v13 = vpop.xlane.xlu0 %2738 }
 0x4f8   :  { %3628 = vrcp.f32 %v2739_v13 }
 0x502   :  { %v3629_v14 = vpop.eup %3628 }
 0x503   :  { %v2741_v15 = vmul.f32 %v3629_v14, %v3627_v12 }
 0x505   :  { %2742 = vst [vmem:[#allocation11] sm:$0xff] %v2741_v15 }
 0x506   :  { %3751 = shalt.err (!%p3748_p2)
}
 0x507   :  { %s3752_s21 = scalar_lea.hbm %s3990_s7, 128 }
 0x508   :  { %p3753_p3 = scmp.ne.s32.totalorder %s3990_s7, %s3752_s21  ;;  %p3756_p4 = scmp.lt.u32.totalorder %s3752_s21, %s3990_s7 }
 0x50a   :  { %p3758_p5 = pnand %p3756_p4, %p3753_p3 }
 0x50c   :  { %3761 = shalt.err (!%p3758_p5)
}
 0x50d   :  { %2752 = dma.vmem_to_hbm [thread:$0]  %s2750_s16, 128, %s3990_s7, [#allocation4]  }
 0x50e   :  { %3768 = dma.done.wait [#allocation4], 128  }
 0x50f   :  { %3769 = vsyncadd [#allocation4], 4294967168 }
 0x510   :  { %2756 = vsyncpa [#allocation3], 1 }
 0x511   :  { %2757 = vsyncpa [#allocation6], 1 }
 0x512   :  { %2758 = vsyncpa [#allocation9], 1 }
 0x513   :  { %2759 = vsyncpa [#allocation4], 1 }

</bundles_post_ra>
